<compile_context>
chip_gen: v7x
topology: tpu7x:2x2x1
jax: 0.10.0
libtpu: 0.0.40
codegen_flags: <defaults>
</compile_context>

<pallas_src>
import functools

import jax
import jax.numpy as jnp
from jax import lax
from jax.experimental import pallas as pl
from jax.experimental.pallas import tpu as pltpu


# ----------------------------------------------------------------------------
# Tiling configuration
# ----------------------------------------------------------------------------
TILE_N_REQ = 4096   # requested entity-tile width (lanes); clamped for small N
N_SHARDS = 2        # split of the entity axis across TensorCores (v7x megacore)


def _round_up(x, m):
    return ((x + m - 1) // m) * m


def _entity_tiling(n_entities):
    """Pick (tile_n, tiles_per_shard, n_pad) so Npad = N_SHARDS * tpj * tile_n."""
    tile_n = max(128, min(_round_up(TILE_N_REQ, 128),
                          _round_up(pl.cdiv(n_entities, N_SHARDS), 128)))
    tiles_total = pl.cdiv(n_entities, tile_n)
    tpj = pl.cdiv(tiles_total, N_SHARDS)
    n_pad = N_SHARDS * tpj * tile_n
    return tile_n, tpj, n_pad


def prepare_entity_table(node_emb):
    """Pre-transposed, zero-padded, bf16 entity table (D, Npad) — built once."""
    n, d = node_emb.shape
    _, _, n_pad = _entity_tiling(n)
    ent_t = jnp.zeros((d, n_pad), jnp.bfloat16)
    return ent_t.at[:, :n].set(node_emb.T.astype(jnp.bfloat16))


# ----------------------------------------------------------------------------
# Fused ComplEx scoring + online-softmax / KL-statistics kernel
# ----------------------------------------------------------------------------
def score_kl_kernel(bn_ref, q_ref, w_ref, b_ref, head_ref, relk_ref,
                    ent_ref, tgt_ref,
                    m_ref, l_ref, c_ref, s_vmem,
                    *, dr, groups, n_entities):
    """Grid = (shard c: parallel, entity tile j: arbitrary/reduction).

    j==0 init (per shard / per core):
      - hidden2rel projection (fused nn.Linear), folded bn0, complex product,
        folded bn2 -> (M, D) query matrix S cast once to bf16 in VMEM scratch.
    Every step: one bf16 MXU matmul (M, D)@(D, tile_n) + online logsumexp and
    target-weighted score sum, accumulated in the (1, M, 1) output blocks.
    """
    c_ax = pl.program_id(0)
    j = pl.program_id(1)
    D = 2 * dr
    tile_n = ent_ref.shape[1]
    B = tgt_ref.shape[0]

    @pl.when(j == 0)
    def _init():
        re_mask = lax.broadcasted_iota(jnp.int32, (1, D), 1) < dr
        # bn_ref (SMEM, 8): [s0_re, t0_re, s0_im, t0_im, s2_re, t2_re, s2_im, t2_im]
        scale0 = jnp.where(re_mask, bn_ref[0], bn_ref[2])
        shift0 = jnp.where(re_mask, bn_ref[1], bn_ref[3])
        scale2 = jnp.where(re_mask, bn_ref[4], bn_ref[6])
        shift2 = jnp.where(re_mask, bn_ref[5], bn_ref[7])
        sign = jnp.where(re_mask, -1.0, 1.0)

        # Fused hidden2rel: rel for the "pred" group from the question embedding.
        rel_q = (jnp.dot(q_ref[...], w_ref[...], preferred_element_type=jnp.float32)
                 + b_ref[...])                                     # (B, D)
        rel_all = jnp.concatenate([rel_q, relk_ref[...]], axis=0)  # (M, D) group-major
        h = head_ref[...] * scale0 + shift0                        # folded bn0
        h_all = jnp.concatenate([h] * groups, axis=0)              # heads dedup'd in HBM

        h_sw = pltpu.roll(h_all, shift=dr, axis=1)                 # [im_h | re_h]
        r_sw = pltpu.roll(rel_all, shift=dr, axis=1)               # [im_r | re_r]
        r_rr = jnp.where(re_mask, rel_all, r_sw)                   # [re_r | re_r]
        r_ii = jnp.where(re_mask, r_sw, rel_all)                   # [im_r | im_r]
        # S = [re_h*re_r - im_h*im_r | im_h*re_r + re_h*im_r], then folded bn2.
        s_full = (h_all * r_rr + sign * (h_sw * r_ii)) * scale2 + shift2
        s_vmem[...] = s_full.astype(s_vmem.dtype)                  # cast to bf16 once

        m_ref[...] = jnp.full_like(m_ref, -1e30)   # finite sentinel (safe merge/exp)
        l_ref[...] = jnp.zeros_like(l_ref)
        c_ref[...] = jnp.zeros_like(c_ref)

    # Additive padding mask for columns >= n_entities (arrays are zero-padded in HBM,
    # only the softmax needs the -1e30; cheap (1, tile_n) row, broadcast on add).
    col0 = (c_ax * pl.num_programs(1) + j) * tile_n
    pad = jnp.where(
        col0 + lax.broadcasted_iota(jnp.int32, (1, tile_n), 1) < n_entities,
        0.0, -1e30)

    # One bf16 x bf16 -> f32 MXU matmul per tile.
    s = jnp.dot(s_vmem[...], ent_ref[...], preferred_element_type=jnp.float32) + pad

    # Online log-sum-exp over the entity axis (per query row).
    m_prev = m_ref[0, :, :]
    m_new = jnp.maximum(m_prev, jnp.max(s, axis=-1, keepdims=True))
    l_ref[0, :, :] = (jnp.exp(m_prev - m_new) * l_ref[0, :, :]
                      + jnp.sum(jnp.exp(s - m_new), axis=-1, keepdims=True))
    m_ref[0, :, :] = m_new

    # sum_j t_bj * s_row_j, with the unique (B, tile_n) target tile broadcast across
    # the R+1 query groups (queries are group-major: row g*B+b <-> target row b).
    t = tgt_ref[...]
    c_ref[0, :, :] += jnp.concatenate(
        [jnp.sum(s[g * B:(g + 1) * B, :] * t, axis=-1, keepdims=True)
         for g in range(groups)], axis=0)


# ----------------------------------------------------------------------------
# Wrapper: pallas_call + tiny JAX epilogue (shard merge + KL finalize)
# ----------------------------------------------------------------------------
def pallas_complex_kl_loss(q_emb, w_t, b_row, head_emb, relk, p_tail, ent_t, bn_vec):
    B, H = q_emb.shape
    D = head_emb.shape[1]
    dr = D // 2
    groups = relk.shape[0] // B + 1          # 1 "pred" group + R kbc groups
    M = groups * B
    N = p_tail.shape[1]
    tile_n, tpj, n_pad = _entity_tiling(N)
    assert ent_t.shape == (D, n_pad), (ent_t.shape, (D, n_pad))

    # Unique targets, zero-padded to the tiled width (never duplicated (R+1)x).
    tgt = jnp.zeros((B, n_pad), jnp.float32).at[:, :N].set(p_tail.astype(jnp.float32))

    kernel = functools.partial(score_kl_kernel, dr=dr, groups=groups, n_entities=N)
    m_sh, l_sh, c_sh = pl.pallas_call(
        kernel,
        out_shape=(jax.ShapeDtypeStruct((N_SHARDS, M, 1), jnp.float32),
                   jax.ShapeDtypeStruct((N_SHARDS, M, 1), jnp.float32),
                   jax.ShapeDtypeStruct((N_SHARDS, M, 1), jnp.float32)),
        grid=(N_SHARDS, tpj),
        in_specs=[
            pl.BlockSpec(memory_space=pltpu.MemorySpace.SMEM),         # folded BN (8,)
            pl.BlockSpec((B, H), lambda c, j: (0, 0)),                 # question emb (resident)
            pl.BlockSpec((H, D), lambda c, j: (0, 0)),                 # hidden2rel W^T (resident)
            pl.BlockSpec((1, D), lambda c, j: (0, 0)),                 # hidden2rel bias
            pl.BlockSpec((B, D), lambda c, j: (0, 0)),                 # unique head rows
            pl.BlockSpec((relk.shape[0], D), lambda c, j: (0, 0)),     # kbc relations (group-major)
            pl.BlockSpec((D, tile_n), lambda c, j: (0, c * tpj + j)),  # bf16 entity tile
            pl.BlockSpec((B, tile_n), lambda c, j: (0, c * tpj + j)),  # dedup'd target tile
        ],
        out_specs=[
            pl.BlockSpec((1, M, 1), lambda c, j: (c, 0, 0)),           # running max (per shard)
            pl.BlockSpec((1, M, 1), lambda c, j: (c, 0, 0)),           # running sum exp
            pl.BlockSpec((1, M, 1), lambda c, j: (c, 0, 0)),           # sum t * score
        ],
        scratch_shapes=[pltpu.VMEM((M, D), jnp.bfloat16)],             # S (query matrix)
        compiler_params=pltpu.CompilerParams(
            dimension_semantics=("parallel", "arbitrary"),
            vmem_limit_bytes=32 * 1024 * 1024),
    )(bn_vec, q_emb, w_t, b_row, head_emb, relk, ent_t, tgt)

    # --- tiny O(M) epilogue: merge the per-shard online-softmax stats -------------
    m_sh, l_sh, c_sh = m_sh[..., 0], l_sh[..., 0], c_sh[..., 0]        # (shards, M)
    m_g = jnp.max(m_sh, axis=0)
    l_g = jnp.sum(l_sh * jnp.exp(m_sh - m_g), axis=0)
    lse = m_g + jnp.log(l_g)
    c_g = jnp.sum(c_sh, axis=0)

    # Target-only sums hoisted off the kernel's hot loop (no per-tile EUP log).
    z_b = jnp.sum(p_tail, axis=1)                                      # sum t
    t_safe = jnp.where(p_tail > 0, p_tail, 1.0)
    a_b = jnp.sum(jnp.where(p_tail > 0, p_tail * jnp.log(t_safe), 0.0), axis=1)
    z_row = jnp.tile(z_b, groups)                                      # group-major rows
    a_row = jnp.tile(a_b, groups)

    # KL_row = sum_j tn_j*(log tn_j - logp_j) = (A - C)/Z - log Z + logsumexp(s)
    zs = jnp.maximum(z_row, 1e-12)
    kl = (a_row - c_g) / zs - jnp.log(zs) + lse
    return jnp.sum(jnp.where(z_row > 0, kl, 0.0))


# ----------------------------------------------------------------------------
# RelationExtractor.forward (train_transformer=False path)
# ----------------------------------------------------------------------------
@jax.jit
def relation_extractor_forward(params, question_embedding, p_head, p_tail, p_rels):
    head_emb = jnp.take(params["node_emb"], p_head, axis=0)            # (B, D)
    path_emb = jnp.take(params["rel_emb"], p_rels, axis=0)             # (B, R, D)
    B, R, D = path_emb.shape
    # (torch.mean(path_embdding, 1) in the reference is dead code -> dropped)

    # Group-major kbc relation rows: row r*B + b holds p_rels[b, r]'s embedding,
    # so rows sharing a head/target are contiguous -> targets streamed once (B rows).
    relk = jnp.transpose(path_emb, (1, 0, 2)).reshape(R * B, D)

    # KLDivLoss(reduction='sum') is additive over rows, so the fused call returns
    # loss + kbc_loss directly; the entity table is streamed from HBM exactly once.
    return pallas_complex_kl_loss(question_embedding, params["w_h2r_t"],
                                  params["b_h2r"], head_emb, relk, p_tail,
                                  params["ent_t"], params["bn_vec"])


# ----------------------------------------------------------------------------
# Pure-JAX reference (sanity check, f32)
# ----------------------------------------------------------------------------
def _complex_ref(head, relation, node_emb, bn_vec):
    dr = head.shape[1] // 2
    re_h = head[:, :dr] * bn_vec[0] + bn_vec[1]
    im_h = head[:, dr:] * bn_vec[2] + bn_vec[3]
    re_r, im_r = relation[:, :dr], relation[:, dr:]
    re_s = (re_h * re_r - im_h * im_r) * bn_vec[4] + bn_vec[5]
    im_s = (re_h * im_r + im_h * re_r) * bn_vec[6] + bn_vec[7]
    return re_s @ node_emb[:, :dr].T + im_s @ node_emb[:, dr:].T


def _kl_ref(scores, targets):
    logp = jax.nn.log_softmax(scores, axis=1)
    tn = targets / jnp.maximum(jnp.sum(jnp.abs(targets), axis=1, keepdims=True), 1e-12)
    safe = jnp.where(tn > 0, tn, 1.0)
    return jnp.sum(jnp.where(tn > 0, tn * (jnp.log(safe) - logp), 0.0))


def _forward_ref(params, q, p_head, p_tail, p_rels):
    rel = q @ params["w_h2r_t"] + params["b_h2r"]
    head_emb = params["node_emb"][p_head]
    pred = _complex_ref(head_emb, rel, params["node_emb"], params["bn_vec"])
    loss = _kl_ref(pred, p_tail)
    path_emb = params["rel_emb"][p_rels]
    B, R, D = path_emb.shape
    head_exp = jnp.broadcast_to(head_emb[:, None, :], (B, R, D)).reshape(B * R, D)
    kbc = _complex_ref(head_exp, path_emb.reshape(B * R, D),
                       params["node_emb"], params["bn_vec"])
    N = p_tail.shape[1]
    act = jnp.broadcast_to(p_tail[:, None, :], (B, R, N)).reshape(B * R, N)
    return loss + _kl_ref(kbc, act)


# ----------------------------------------------------------------------------
# main
# ----------------------------------------------------------------------------
if __name__ == "__main__":
    key = jax.random.PRNGKey(0)
    B = 8            # batch
    dr = 64          # relation_dim  -> ComplEx multiplier 2 -> entity dim D = 128
    D = 2 * dr
    N = 1000         # num_entities (NOT a tile multiple: exercises padding + masking)
    NR = 16          # number of relation types
    R = 3            # relations per example (p_rels width)
    H = 768          # roberta hidden_dim

    ks = jax.random.split(key, 12)
    node_emb = jax.random.normal(ks[0], (N, D), jnp.float32) * 0.1
    rel_emb = jax.random.normal(ks[1], (NR, D), jnp.float32) * 0.1
    w_h2r = jax.random.normal(ks[2], (D, H), jnp.float32) * (1.0 / jnp.sqrt(H))
    b_h2r = jax.random.normal(ks[3], (D,), jnp.float32) * 0.01

    # BatchNorm1d(2) (bn0 / bn2), eval mode, folded into per-channel scale/shift.
    eps = 1e-5
    def fold(gamma, beta, rmean, rvar):
        scale = gamma / jnp.sqrt(rvar + eps)
        return scale, beta - rmean * scale
    s0, t0 = fold(jnp.array([1.10, 0.90]), jnp.array([0.05, -0.03]),
                  jnp.array([0.01, -0.02]), jnp.array([1.20, 0.80]))
    s2, t2 = fold(jnp.array([0.95, 1.05]), jnp.array([-0.02, 0.04]),
                  jnp.array([0.03, 0.01]), jnp.array([0.90, 1.10]))
    bn_vec = jnp.array([s0[0], t0[0], s0[1], t0[1],
                        s2[0], t2[0], s2[1], t2[1]], jnp.float32)

    params = {
        "node_emb": node_emb,
        "ent_t": prepare_entity_table(node_emb),   # (D, Npad) bf16, pre-transposed+padded
        "rel_emb": rel_emb,
        "w_h2r_t": w_h2r.T,                        # (H, D) pre-transposed nn.Linear weight
        "b_h2r": b_h2r.reshape(1, D),
        "bn_vec": bn_vec,
    }

    # Inputs
    question_embedding = jax.random.normal(ks[4], (B, H), jnp.float32)  # RoBERTa CLS stand-in
    p_head = jax.random.randint(ks[5], (B,), 0, N)
    tail_idx = jax.random.randint(ks[6], (B,), 0, N)
    tail_idx2 = jax.random.randint(ks[7], (B,), 0, N)
    # multi-hot non-negative targets (exercises the L1 normalization + entropy terms)
    p_tail = (jax.nn.one_hot(tail_idx, N, dtype=jnp.float32)
              + 0.5 * jax.nn.one_hot(tail_idx2, N, dtype=jnp.float32))
    p_rels = jax.random.randint(ks[8], (B, R), 0, NR)

    total_loss = relation_extractor_forward(params, question_embedding, p_head, p_tail, p_rels)
    total_loss = jax.block_until_ready(total_loss)

    ref_loss = _forward_ref(params, question_embedding, p_head, p_tail, p_rels)
    assert jnp.isfinite(total_loss), "loss is not finite"
    # bf16 entity table / query matrix vs. f32 reference -> slightly loosened tolerance.
    assert jnp.allclose(total_loss, ref_loss, rtol=2e-2, atol=2e-2), (total_loss, ref_loss)

    print("KERNEL_OK")
</pallas_src>

<mosaic_0001>
module attributes {stable_mosaic.version = 11 : i64} {
  func.func @score_kl_kernel(%arg0: i32, %arg1: i32, %arg2: memref<8xf32, #tpu.memory_space<smem>>, %arg3: memref<8x768xf32, #tpu.memory_space<vmem>>, %arg4: memref<768x128xf32, #tpu.memory_space<vmem>>, %arg5: memref<1x128xf32, #tpu.memory_space<vmem>>, %arg6: memref<8x128xf32, #tpu.memory_space<vmem>>, %arg7: memref<24x128xf32, #tpu.memory_space<vmem>>, %arg8: memref<128x512xbf16, #tpu.memory_space<vmem>>, %arg9: memref<8x512xf32, #tpu.memory_space<vmem>>, %arg10: memref<1x32x1xf32, #tpu.memory_space<vmem>>, %arg11: memref<1x32x1xf32, #tpu.memory_space<vmem>>, %arg12: memref<1x32x1xf32, #tpu.memory_space<vmem>>, %arg13: memref<32x128xbf16, #tpu.memory_space<vmem>>) attributes {dimension_semantics = [#tpu.dimension_semantics<parallel>, #tpu.dimension_semantics<arbitrary>], iteration_bounds = array<i64: 2, 1>, scalar_prefetch = 0 : i64, scratch_operands = 1 : i64, tpu.core_type = #tpu.core_type<tc>, window_params = [{transform_indices = @transform_0, window_bounds = array<i64: 8>}, {pipeline_mode = #tpu.pipeline_mode<synchronous>, transform_indices = @transform_1, window_bounds = array<i64: 8, 768>}, {pipeline_mode = #tpu.pipeline_mode<synchronous>, transform_indices = @transform_2, window_bounds = array<i64: 768, 128>}, {pipeline_mode = #tpu.pipeline_mode<synchronous>, transform_indices = @transform_3, window_bounds = array<i64: 1, 128>}, {pipeline_mode = #tpu.pipeline_mode<synchronous>, transform_indices = @transform_4, window_bounds = array<i64: 8, 128>}, {pipeline_mode = #tpu.pipeline_mode<synchronous>, transform_indices = @transform_5, window_bounds = array<i64: 24, 128>}, {transform_indices = @transform_6, window_bounds = array<i64: 128, 512>}, {transform_indices = @transform_7, window_bounds = array<i64: 8, 512>}, {transform_indices = @transform_8, window_bounds = array<i64: 1, 32, 1>}, {transform_indices = @transform_9, window_bounds = array<i64: 1, 32, 1>}, {transform_indices = @transform_10, window_bounds = array<i64: 1, 32, 1>}]} {
    %c0_i32 = arith.constant 0 : i32
    %0 = arith.cmpi eq, %arg1, %c0_i32 : i32
    %1 = arith.extui %0 : i1 to i32
    %c0_i32_0 = arith.constant 0 : i32
    %2 = arith.cmpi ne, %1, %c0_i32_0 : i32
    scf.if %2 {
      %65 = tpu.iota {dimensions = array<i32: 1>} : vector<1x128xi32>
      %c64_i32 = arith.constant 64 : i32
      %66 = vector.broadcast %c64_i32 : i32 to vector<1x128xi32>
      %67 = arith.cmpi slt, %65, %66 : vector<1x128xi32>
      %c0_32 = arith.constant 0 : index
      %68 = memref.load %arg2[%c0_32] : memref<8xf32, #tpu.memory_space<smem>>
      %c2 = arith.constant 2 : index
      %69 = memref.load %arg2[%c2] : memref<8xf32, #tpu.memory_space<smem>>
      %70 = vector.broadcast %68 : f32 to vector<1x128xf32>
      %71 = vector.broadcast %69 : f32 to vector<1x128xf32>
      %72 = arith.select %67, %70, %71 : vector<1x128xi1>, vector<1x128xf32>
      %c1 = arith.constant 1 : index
      %73 = memref.load %arg2[%c1] : memref<8xf32, #tpu.memory_space<smem>>
      %c3 = arith.constant 3 : index
      %74 = memref.load %arg2[%c3] : memref<8xf32, #tpu.memory_space<smem>>
      %75 = vector.broadcast %73 : f32 to vector<1x128xf32>
      %76 = vector.broadcast %74 : f32 to vector<1x128xf32>
      %77 = arith.select %67, %75, %76 : vector<1x128xi1>, vector<1x128xf32>
      %c4 = arith.constant 4 : index
      %78 = memref.load %arg2[%c4] : memref<8xf32, #tpu.memory_space<smem>>
      %c6 = arith.constant 6 : index
      %79 = memref.load %arg2[%c6] : memref<8xf32, #tpu.memory_space<smem>>
      %80 = vector.broadcast %78 : f32 to vector<1x128xf32>
      %81 = vector.broadcast %79 : f32 to vector<1x128xf32>
      %82 = arith.select %67, %80, %81 : vector<1x128xi1>, vector<1x128xf32>
      %c5 = arith.constant 5 : index
      %83 = memref.load %arg2[%c5] : memref<8xf32, #tpu.memory_space<smem>>
      %c7 = arith.constant 7 : index
      %84 = memref.load %arg2[%c7] : memref<8xf32, #tpu.memory_space<smem>>
      %85 = vector.broadcast %83 : f32 to vector<1x128xf32>
      %86 = vector.broadcast %84 : f32 to vector<1x128xf32>
      %87 = arith.select %67, %85, %86 : vector<1x128xi1>, vector<1x128xf32>
      %cst_33 = arith.constant -1.000000e+00 : f32
      %cst_34 = arith.constant 1.000000e+00 : f32
      %88 = vector.broadcast %cst_33 : f32 to vector<1x128xf32>
      %89 = vector.broadcast %cst_34 : f32 to vector<1x128xf32>
      %90 = arith.select %67, %88, %89 : vector<1x128xi1>, vector<1x128xf32>
      %c0_35 = arith.constant 0 : index
      %c0_36 = arith.constant 0 : index
      %91 = vector.load %arg3[%c0_35, %c0_36] : memref<8x768xf32, #tpu.memory_space<vmem>>, vector<8x768xf32>
      %c0_37 = arith.constant 0 : index
      %c0_38 = arith.constant 0 : index
      %92 = vector.load %arg4[%c0_37, %c0_38] : memref<768x128xf32, #tpu.memory_space<vmem>>, vector<768x128xf32>
      %cst_39 = arith.constant dense<0.000000e+00> : vector<8x128xf32>
      %93 = tpu.matmul %91, %92, %cst_39 {dimension_numbers = #tpu.dot_dimension_numbers<[1], [0], [0], [1], [0, 0, 1, 1], [], []>} : vector<8x768xf32>, vector<768x128xf32>, vector<8x128xf32> -> vector<8x128xf32>
      %c0_40 = arith.constant 0 : index
      %c0_41 = arith.constant 0 : index
      %94 = vector.load %arg5[%c0_40, %c0_41] : memref<1x128xf32, #tpu.memory_space<vmem>>, vector<1x128xf32>
      %95 = vector.broadcast %94 : vector<1x128xf32> to vector<8x128xf32>
      %96 = arith.addf %93, %95 : vector<8x128xf32>
      %c0_42 = arith.constant 0 : index
      %c0_43 = arith.constant 0 : index
      %97 = vector.load %arg7[%c0_42, %c0_43] : memref<24x128xf32, #tpu.memory_space<vmem>>, vector<24x128xf32>
      %98 = tpu.concatenate %96, %97 in 0 : vector<8x128xf32>, vector<24x128xf32> -> vector<32x128xf32>
      %c0_44 = arith.constant 0 : index
      %c0_45 = arith.constant 0 : index
      %99 = vector.load %arg6[%c0_44, %c0_45] : memref<8x128xf32, #tpu.memory_space<vmem>>, vector<8x128xf32>
      %100 = vector.broadcast %72 : vector<1x128xf32> to vector<8x128xf32>
      %101 = arith.mulf %99, %100 : vector<8x128xf32>
      %102 = vector.broadcast %77 : vector<1x128xf32> to vector<8x128xf32>
      %103 = arith.addf %101, %102 : vector<8x128xf32>
      %104 = tpu.concatenate %103, %103, %103, %103 in 0 : vector<8x128xf32>, vector<8x128xf32>, vector<8x128xf32>, vector<8x128xf32> -> vector<32x128xf32>
      %c64_i32_46 = arith.constant 64 : i32
      %105 = tpu.dynamic_rotate %104 by %c64_i32_46 dim 1 : vector<32x128xf32>, i32 -> vector<32x128xf32>
      %c64_i32_47 = arith.constant 64 : i32
      %106 = tpu.dynamic_rotate %98 by %c64_i32_47 dim 1 : vector<32x128xf32>, i32 -> vector<32x128xf32>
      %107 = vector.shape_cast %67 : vector<1x128xi1> to vector<1x128xi1>
      %108 = vector.broadcast %107 : vector<1x128xi1> to vector<32x128xi1>
      %109 = arith.select %108, %98, %106 : vector<32x128xi1>, vector<32x128xf32>
      %110 = vector.shape_cast %67 : vector<1x128xi1> to vector<1x128xi1>
      %111 = vector.broadcast %110 : vector<1x128xi1> to vector<32x128xi1>
      %112 = arith.select %111, %106, %98 : vector<32x128xi1>, vector<32x128xf32>
      %113 = arith.mulf %104, %109 : vector<32x128xf32>
      %114 = arith.mulf %105, %112 : vector<32x128xf32>
      %115 = vector.broadcast %90 : vector<1x128xf32> to vector<32x128xf32>
      %116 = arith.mulf %115, %114 : vector<32x128xf32>
      %117 = arith.addf %113, %116 : vector<32x128xf32>
      %118 = vector.broadcast %82 : vector<1x128xf32> to vector<32x128xf32>
      %119 = arith.mulf %117, %118 : vector<32x128xf32>
      %120 = vector.broadcast %87 : vector<1x128xf32> to vector<32x128xf32>
      %121 = arith.addf %119, %120 : vector<32x128xf32>
      %122 = arith.truncf %121 : vector<32x128xf32> to vector<32x128xbf16>
      %c0_48 = arith.constant 0 : index
      %c0_49 = arith.constant 0 : index
      %123 = vector.load %arg13[%c0_48, %c0_49] : memref<32x128xbf16, #tpu.memory_space<vmem>>, vector<32x128xbf16>
      tpu.vector_store %arg13[%c0_48, %c0_49], %122 {strides = array<i32>} : memref<32x128xbf16, #tpu.memory_space<vmem>>, vector<32x128xbf16>,
      %cst_50 = arith.constant -1.000000e+30 : f32
      %124 = vector.broadcast %cst_50 : f32 to vector<1x32x1xf32>
      %c0_51 = arith.constant 0 : index
      %c0_52 = arith.constant 0 : index
      %c0_53 = arith.constant 0 : index
      %125 = vector.load %arg10[%c0_51, %c0_52, %c0_53] : memref<1x32x1xf32, #tpu.memory_space<vmem>>, vector<1x32x1xf32>
      tpu.vector_store %arg10[%c0_51, %c0_52, %c0_53], %124 {strides = array<i32>} : memref<1x32x1xf32, #tpu.memory_space<vmem>>, vector<1x32x1xf32>,
      %cst_54 = arith.constant 0.000000e+00 : f32
      %126 = vector.broadcast %cst_54 : f32 to vector<1x32x1xf32>
      %c0_55 = arith.constant 0 : index
      %c0_56 = arith.constant 0 : index
      %c0_57 = arith.constant 0 : index
      %127 = vector.load %arg11[%c0_55, %c0_56, %c0_57] : memref<1x32x1xf32, #tpu.memory_space<vmem>>, vector<1x32x1xf32>
      tpu.vector_store %arg11[%c0_55, %c0_56, %c0_57], %126 {strides = array<i32>} : memref<1x32x1xf32, #tpu.memory_space<vmem>>, vector<1x32x1xf32>,
      %cst_58 = arith.constant 0.000000e+00 : f32
      %128 = vector.broadcast %cst_58 : f32 to vector<1x32x1xf32>
      %c0_59 = arith.constant 0 : index
      %c0_60 = arith.constant 0 : index
      %c0_61 = arith.constant 0 : index
      %129 = vector.load %arg12[%c0_59, %c0_60, %c0_61] : memref<1x32x1xf32, #tpu.memory_space<vmem>>, vector<1x32x1xf32>
      tpu.vector_store %arg12[%c0_59, %c0_60, %c0_61], %128 {strides = array<i32>} : memref<1x32x1xf32, #tpu.memory_space<vmem>>, vector<1x32x1xf32>,
    } else {
    }
    %c1_i32 = arith.constant 1 : i32
    %3 = arith.muli %arg0, %c1_i32 : i32
    %4 = arith.addi %3, %arg1 : i32
    %c512_i32 = arith.constant 512 : i32
    %5 = arith.muli %4, %c512_i32 : i32
    %6 = tpu.iota {dimensions = array<i32: 1>} : vector<1x512xi32>
    %7 = vector.broadcast %5 : i32 to vector<1x512xi32>
    %8 = arith.addi %7, %6 : vector<1x512xi32>
    %c1000_i32 = arith.constant 1000 : i32
    %9 = vector.broadcast %c1000_i32 : i32 to vector<1x512xi32>
    %10 = arith.cmpi slt, %8, %9 : vector<1x512xi32>
    %cst = arith.constant 0.000000e+00 : f32
    %cst_1 = arith.constant -1.000000e+30 : f32
    %11 = vector.broadcast %cst : f32 to vector<1x512xf32>
    %12 = vector.broadcast %cst_1 : f32 to vector<1x512xf32>
    %13 = arith.select %10, %11, %12 : vector<1x512xi1>, vector<1x512xf32>
    %c0 = arith.constant 0 : index
    %c0_2 = arith.constant 0 : index
    %14 = vector.load %arg13[%c0, %c0_2] : memref<32x128xbf16, #tpu.memory_space<vmem>>, vector<32x128xbf16>
    %c0_3 = arith.constant 0 : index
    %c0_4 = arith.constant 0 : index
    %15 = vector.load %arg8[%c0_3, %c0_4] : memref<128x512xbf16, #tpu.memory_space<vmem>>, vector<128x512xbf16>
    %cst_5 = arith.constant dense<0.000000e+00> : vector<32x512xf32>
    %16 = tpu.matmul %14, %15, %cst_5 {dimension_numbers = #tpu.dot_dimension_numbers<[1], [0], [0], [1], [0, 0, 1, 1], [], []>} : vector<32x128xbf16>, vector<128x512xbf16>, vector<32x512xf32> -> vector<32x512xf32>
    %17 = vector.broadcast %13 : vector<1x512xf32> to vector<32x512xf32>
    %18 = arith.addf %16, %17 : vector<32x512xf32>
    %c0_6 = arith.constant 0 : index
    %c0_7 = arith.constant 0 : index
    %c0_8 = arith.constant 0 : index
    %19 = vector.load %arg10[%c0_6, %c0_7, %c0_8] : memref<1x32x1xf32, #tpu.memory_space<vmem>>, vector<1x32x1xf32>
    %20 = vector.shape_cast %19 : vector<1x32x1xf32> to vector<32x1xf32>
    %cst_9 = arith.constant dense<0xFF800000> : vector<32xf32>
    %21 = vector.multi_reduction <maximumf>, %18, %cst_9 [1] : vector<32x512xf32> to vector<32xf32>
    %22 = vector.shape_cast %21 : vector<32xf32> to vector<32x1xf32>
    %23 = arith.maximumf %20, %22 : vector<32x1xf32>
    %24 = arith.subf %20, %23 : vector<32x1xf32>
    %25 = math.exp %24 : vector<32x1xf32>
    %c0_10 = arith.constant 0 : index
    %c0_11 = arith.constant 0 : index
    %c0_12 = arith.constant 0 : index
    %26 = vector.load %arg11[%c0_10, %c0_11, %c0_12] : memref<1x32x1xf32, #tpu.memory_space<vmem>>, vector<1x32x1xf32>
    %27 = vector.shape_cast %26 : vector<1x32x1xf32> to vector<32x1xf32>
    %28 = arith.mulf %25, %27 : vector<32x1xf32>
    %29 = vector.broadcast %23 : vector<32x1xf32> to vector<32x512xf32>
    %30 = arith.subf %18, %29 : vector<32x512xf32>
    %31 = math.exp %30 : vector<32x512xf32>
    %cst_13 = arith.constant dense<0.000000e+00> : vector<32xf32>
    %32 = vector.multi_reduction <add>, %31, %cst_13 [1] : vector<32x512xf32> to vector<32xf32>
    %33 = vector.shape_cast %32 : vector<32xf32> to vector<32x1xf32>
    %34 = arith.addf %28, %33 : vector<32x1xf32>
    %c0_14 = arith.constant 0 : index
    %c0_15 = arith.constant 0 : index
    %c0_16 = arith.constant 0 : index
    %35 = vector.load %arg11[%c0_14, %c0_15, %c0_16] : memref<1x32x1xf32, #tpu.memory_space<vmem>>, vector<1x32x1xf32>
    %36 = vector.shape_cast %35 : vector<1x32x1xf32> to vector<32x1xf32>
    %37 = vector.shape_cast %34 : vector<32x1xf32> to vector<1x32x1xf32>
    tpu.vector_store %arg11[%c0_14, %c0_15, %c0_16], %37 {strides = array<i32>} : memref<1x32x1xf32, #tpu.memory_space<vmem>>, vector<1x32x1xf32>,
    %c0_17 = arith.constant 0 : index
    %c0_18 = arith.constant 0 : index
    %c0_19 = arith.constant 0 : index
    %38 = vector.load %arg10[%c0_17, %c0_18, %c0_19] : memref<1x32x1xf32, #tpu.memory_space<vmem>>, vector<1x32x1xf32>
    %39 = vector.shape_cast %38 : vector<1x32x1xf32> to vector<32x1xf32>
    %40 = vector.shape_cast %23 : vector<32x1xf32> to vector<1x32x1xf32>
    tpu.vector_store %arg10[%c0_17, %c0_18, %c0_19], %40 {strides = array<i32>} : memref<1x32x1xf32, #tpu.memory_space<vmem>>, vector<1x32x1xf32>,
    %c0_20 = arith.constant 0 : index
    %c0_21 = arith.constant 0 : index
    %41 = vector.load %arg9[%c0_20, %c0_21] : memref<8x512xf32, #tpu.memory_space<vmem>>, vector<8x512xf32>
    %c0_22 = arith.constant 0 : index
    %c0_23 = arith.constant 0 : index
    %c0_24 = arith.constant 0 : index
    %42 = vector.load %arg12[%c0_22, %c0_23, %c0_24] : memref<1x32x1xf32, #tpu.memory_space<vmem>>, vector<1x32x1xf32>
    %43 = vector.shape_cast %42 : vector<1x32x1xf32> to vector<32x1xf32>
    %44 = vector.extract_strided_slice %18 {offsets = [0, 0], sizes = [8, 512], strides = [1, 1]} : vector<32x512xf32> to vector<8x512xf32>
    %45 = arith.mulf %44, %41 : vector<8x512xf32>
    %cst_25 = arith.constant dense<0.000000e+00> : vector<8xf32>
    %46 = vector.multi_reduction <add>, %45, %cst_25 [1] : vector<8x512xf32> to vector<8xf32>
    %47 = vector.shape_cast %46 : vector<8xf32> to vector<8x1xf32>
    %48 = vector.extract_strided_slice %18 {offsets = [8, 0], sizes = [8, 512], strides = [1, 1]} : vector<32x512xf32> to vector<8x512xf32>
    %49 = arith.mulf %48, %41 : vector<8x512xf32>
    %cst_26 = arith.constant dense<0.000000e+00> : vector<8xf32>
    %50 = vector.multi_reduction <add>, %49, %cst_26 [1] : vector<8x512xf32> to vector<8xf32>
    %51 = vector.shape_cast %50 : vector<8xf32> to vector<8x1xf32>
    %52 = vector.extract_strided_slice %18 {offsets = [16, 0], sizes = [8, 512], strides = [1, 1]} : vector<32x512xf32> to vector<8x512xf32>
    %53 = arith.mulf %52, %41 : vector<8x512xf32>
    %cst_27 = arith.constant dense<0.000000e+00> : vector<8xf32>
    %54 = vector.multi_reduction <add>, %53, %cst_27 [1] : vector<8x512xf32> to vector<8xf32>
    %55 = vector.shape_cast %54 : vector<8xf32> to vector<8x1xf32>
    %56 = vector.extract_strided_slice %18 {offsets = [24, 0], sizes = [8, 512], strides = [1, 1]} : vector<32x512xf32> to vector<8x512xf32>
    %57 = arith.mulf %56, %41 : vector<8x512xf32>
    %cst_28 = arith.constant dense<0.000000e+00> : vector<8xf32>
    %58 = vector.multi_reduction <add>, %57, %cst_28 [1] : vector<8x512xf32> to vector<8xf32>
    %59 = vector.shape_cast %58 : vector<8xf32> to vector<8x1xf32>
    %60 = tpu.concatenate %47, %51, %55, %59 in 0 : vector<8x1xf32>, vector<8x1xf32>, vector<8x1xf32>, vector<8x1xf32> -> vector<32x1xf32>
    %61 = arith.addf %43, %60 : vector<32x1xf32>
    %c0_29 = arith.constant 0 : index
    %c0_30 = arith.constant 0 : index
    %c0_31 = arith.constant 0 : index
    %62 = vector.load %arg12[%c0_29, %c0_30, %c0_31] : memref<1x32x1xf32, #tpu.memory_space<vmem>>, vector<1x32x1xf32>
    %63 = vector.shape_cast %62 : vector<1x32x1xf32> to vector<32x1xf32>
    %64 = vector.shape_cast %61 : vector<32x1xf32> to vector<1x32x1xf32>
    tpu.vector_store %arg12[%c0_29, %c0_30, %c0_31], %64 {strides = array<i32>} : memref<1x32x1xf32, #tpu.memory_space<vmem>>, vector<1x32x1xf32>,
    return
  }
  func.func @transform_0(%arg0: i32, %arg1: i32) -> i32 {
    %c0_i32 = arith.constant 0 : i32
    %c0_i32_0 = arith.constant 0 : i32
    return %c0_i32 : i32
  }
  func.func @transform_1(%arg0: i32, %arg1: i32) -> (i32, i32) {
    %c0_i32 = arith.constant 0 : i32
    %c0_i32_0 = arith.constant 0 : i32
    %c0_i32_1 = arith.constant 0 : i32
    return %c0_i32, %c0_i32_0 : i32, i32
  }
  func.func @transform_2(%arg0: i32, %arg1: i32) -> (i32, i32) {
    %c0_i32 = arith.constant 0 : i32
    %c0_i32_0 = arith.constant 0 : i32
    %c0_i32_1 = arith.constant 0 : i32
    return %c0_i32, %c0_i32_0 : i32, i32
  }
  func.func @transform_3(%arg0: i32, %arg1: i32) -> (i32, i32) {
    %c0_i32 = arith.constant 0 : i32
    %c0_i32_0 = arith.constant 0 : i32
    %c0_i32_1 = arith.constant 0 : i32
    return %c0_i32, %c0_i32_0 : i32, i32
  }
  func.func @transform_4(%arg0: i32, %arg1: i32) -> (i32, i32) {
    %c0_i32 = arith.constant 0 : i32
    %c0_i32_0 = arith.constant 0 : i32
    %c0_i32_1 = arith.constant 0 : i32
    return %c0_i32, %c0_i32_0 : i32, i32
  }
  func.func @transform_5(%arg0: i32, %arg1: i32) -> (i32, i32) {
    %c0_i32 = arith.constant 0 : i32
    %c0_i32_0 = arith.constant 0 : i32
    %c0_i32_1 = arith.constant 0 : i32
    return %c0_i32, %c0_i32_0 : i32, i32
  }
  func.func @transform_6(%arg0: i32, %arg1: i32) -> (i32, i32) {
    %c1_i32 = arith.constant 1 : i32
    %0 = arith.muli %arg0, %c1_i32 : i32
    %1 = arith.addi %0, %arg1 : i32
    %c0_i32 = arith.constant 0 : i32
    %c0_i32_0 = arith.constant 0 : i32
    return %c0_i32, %1 : i32, i32
  }
  func.func @transform_7(%arg0: i32, %arg1: i32) -> (i32, i32) {
    %c1_i32 = arith.constant 1 : i32
    %0 = arith.muli %arg0, %c1_i32 : i32
    %1 = arith.addi %0, %arg1 : i32
    %c0_i32 = arith.constant 0 : i32
    %c0_i32_0 = arith.constant 0 : i32
    return %c0_i32, %1 : i32, i32
  }
  func.func @transform_8(%arg0: i32, %arg1: i32) -> (i32, i32, i32) {
    %c0_i32 = arith.constant 0 : i32
    %c0_i32_0 = arith.constant 0 : i32
    %c0_i32_1 = arith.constant 0 : i32
    return %arg0, %c0_i32, %c0_i32_0 : i32, i32, i32
  }
  func.func @transform_9(%arg0: i32, %arg1: i32) -> (i32, i32, i32) {
    %c0_i32 = arith.constant 0 : i32
    %c0_i32_0 = arith.constant 0 : i32
    %c0_i32_1 = arith.constant 0 : i32
    return %arg0, %c0_i32, %c0_i32_0 : i32, i32, i32
  }
  func.func @transform_10(%arg0: i32, %arg1: i32) -> (i32, i32, i32) {
    %c0_i32 = arith.constant 0 : i32
    %c0_i32_0 = arith.constant 0 : i32
    %c0_i32_1 = arith.constant 0 : i32
    return %arg0, %c0_i32, %c0_i32_0 : i32, i32, i32
  }
}

</mosaic_0001>

<bundles_post_ra>
// kernel: relation_extractor_forward.1
= control target key start
LH: loop header
LB: loop body
LE: loop exit
PB: predicated region body
PF: predicated region fallthrough
CT: control target
= control target key end

     0   :  { %s2886_s0 = inlined_call_operand.vmem [shape: f32[8], index: 0, kind: input, shape index: {}]   ;;  %s2887_s1 = inlined_call_operand.vmem [shape: f32[8,768], index: 1, kind: input, shape index: {}]   ;;  %s2888_s2 = inlined_call_operand.hbm [shape: f32[768,128], index: 2, kind: input, shape index: {}]   ;;  %s2889_s3 = inlined_call_operand.vmem [shape: f32[1,128], index: 3, kind: input, shape index: {}]   ;;  %s2890_s4 = inlined_call_operand.vmem [shape: f32[8,128], index: 4, kind: input, shape index: {}]   ;;  %s2891_s5 = inlined_call_operand.vmem [shape: f32[24,128], index: 5, kind: input, shape index: {}]   ;;  %s2892_s6 = inlined_call_operand.vmem [shape: bf16[128,1024], index: 6, kind: input, shape index: {}]   ;;  %s2893_s7 = inlined_call_operand.vmem [shape: f32[8,1024], index: 7, kind: input, shape index: {}]   ;;  %s2894_s8 = inlined_call_operand.vmem [shape: f32[2,32,1], index: 8, kind: output, shape index: {0}]   ;;  %s2895_s9 = inlined_call_operand.vmem [shape: f32[2,32,1], index: 9, kind: output, shape index: {1}]   ;;  %s2896_s10 = inlined_call_operand.vmem [shape: f32[2,32,1], index: 10, kind: output, shape index: {2}]  }
   0x1   :  { %2900 = sst [smem:[#allocation11_spill]] %s2886_s0 }
   0x2   :  { %16 = vsyncpa [#allocation5], 0 }
   0x3   :  { %17 = vsyncpa [#allocation4], 0  ;;  %s2249_s13 = smov 0   ;;  %s2251_s14 = smov 0  }
   0x4   :  { %s2253_s15 = smov 0   ;;  %s2255_s16 = smov 0  }
   0x5   :  { %s2257_s17 = smov 0  }
   0x6 LB: > { %s1651_s18 = sadd.s32 4294967295, %s2183_s17   ;;  %s35_s19 = sadd.s32 1, %s2179_s16  ;;  %s2183_s17 = sphi %s2257_s17, %s23_s17   ;;  %s2179_s16 = sphi %s2255_s16, %s2912_s16   ;;  %s2175_s15 = sphi %s2253_s15, %s2911_s15   ;;  %s2171_s14 = sphi %s2251_s14, %s2910_s14   ;;  %s2167_s13 = sphi %s2249_s13, %s2909_s13  }
   0x7   : > { %p37_p0 = scmp.ge.s32.totalorder %s35_s19, 2  ;;  %s170_s20 = sadd.s32 1, %s2171_s14 }
   0x8   : > { %p177_p1 = scmp.ne.s32.totalorder %s2171_s14, %s2167_s13  ;;  %p178_p2 = scmp.eq.s32.totalorder %s2183_s17, 0 }
   0x9   : > { %s2914_s19 = smov (%p37_p0, %s35_s19), 0  ;;  %p1653_p4 = scmp.ge.s32.totalorder %s2183_s17, 1 }
   0xa   : > { %2901 = sst [smem:[#allocation10_spill]] %s2914_s19  ;;  %p2282_p3 = por %p178_p2, %p177_p1 }
   0xb   : > { %s167_s22 = ssub.s32 %s2179_s16, %s2914_s19  ;;  %p300_p5 = scmp.lt.s32.totalorder %s2183_s17, 3 }
   0xc   : > { %p168_p6 = scmp.eq.s32.totalorder %s167_s22, 0  ;;  %p2294_p8 = scmp.eq.s32.totalorder %s1651_s18, 0 }
   0xd   : > { %p2290_p7 = pnand %p1653_p4, %p300_p5  ;;  %s2905_s0 = sld [smem:[#allocation11_spill]] }
   0xe   : > { %s2904_s24 = scalar_select %p2294_p8, 1, 0 }
   0xf   : > { %s2299_s25 = scalar_select %p168_p6, %s2171_s14, %s170_s20  }
  0x10   : > { %p1944_p9 = pneg %p2290_p7  ;;  %s2185_s30 = smov [#allocation6]  }
  0x11   : > { %s326_s11 = sshll.u32 %s2185_s30, 4  ;;  %s2312_s11 = int_to_ptr.vmem [resolvable:$true] %s326_s11 }
  0x12   : > { %p2308_p10 = pnand %p2294_p8, %p1944_p9 }
  0x13   : > { %s313_s28 = sshll.u32 %s2905_s0, 4  ;;  %s314_s28 = int_to_ptr.vmem [resolvable:$true] %s313_s28 }
  0x14   : > { %s2094_s12 = scalar_lea.vmem %s314_s28, 16  ;;  %p2096_p12 = pneg %p2308_p10 }
  0x15   : > { %p2095_p11 = scmp.ne.s32.totalorder %s314_s28, %s2094_s12  ;;  %p2102_p1 = scmp.lt.s32.totalorder %s314_s28, %s314_s28 }
  0x16   : > { %p2103_p2 = scmp.lt.s32.totalorder %s2094_s12, %s2094_s12 }
  0x17   : > { %p2097_p13 = pnand %p2096_p12, %p2095_p11 }
  0x18   : > { %p2104_p4 = por %p2103_p2, %p2102_p1 }
  0x19   : > { %p2098_p0 = pneg %p2097_p13 }
  0x1b   : > { %p2105_p5 = pnand %p2104_p4, %p2098_p0 }
  0x1d   : > { %2108 = shalt.err (!%p2105_p5)
}
  0x1e   : > { %s2186_s18 = smov [#allocation3]   ;;  %s2109_s26 = scalar_lea.hbm %s2888_s2, 12288 }
  0x1f   : > { %1947 = dma.vmem_to_smem (!%p2308_p10), %s314_s28, 16, %s2186_s18, [#allocation5]  }
  0x20   : > { %p2110_p6 = scmp.ne.s32.totalorder %s2888_s2, %s2109_s26  ;;  %p2116_p13 = scmp.lt.u32.totalorder %s2109_s26, %s2888_s2 }
  0x22   : > { %p2112_p9 = pnand %p2110_p6, %p2096_p12 }
  0x24   : > { %p2113_p11 = pneg %p2112_p9 }
  0x26   : > { %p2118_p0 = pnand %p2116_p13, %p2113_p11 }
  0x28   : > { %2121 = shalt.err (!%p2118_p0)
}
  0x29   : > { %s2122_s28 = scalar_lea.vmem %s2312_s11, 12288  ;;  %p2130_p5 = scmp.lt.s32.totalorder %s2312_s11, %s2312_s11 }
  0x2a   : > { %p2123_p1 = scmp.ne.s32.totalorder %s2312_s11, %s2122_s28  ;;  %p2131_p6 = scmp.lt.s32.totalorder %s2122_s28, %s2122_s28 }
  0x2c   : > { %p2125_p2 = pnand %p2123_p1, %p2096_p12  ;;  %p2132_p9 = por %p2131_p6, %p2130_p5 }
  0x2e   : > { %p2126_p4 = pneg %p2125_p2 }
  0x30   : > { %p2133_p8 = pnand %p2132_p9, %p2126_p4 }
  0x32   : > { %2136 = shalt.err (!%p2133_p8)
}
  0x33   : > { %s2187_s0 = smov 128   ;;  %s2188_s18 = smov 8  }
  0x34   : > { %1950 = dma.hbm_to_vmem [thread:$0]  (!%p2308_p10), %s2888_s2, 12288, %s2312_s11, [#allocation4], %s2187_s0, %s2187_s0, %s2188_s18  }
  0x35   : > { %p1656_p11 = scmp.ge.s32.totalorder %s2183_s17, 2 }
  0x37   : > { %345 = sbr.rel (%p1656_p11) target bundleno = 82 (0x52), region = 40 }
  0x3e   : > { %348 = sbr.rel (!%p2282_p3) target bundleno = 82 (0x52), region = 44  ;;  %s350_s26 = sand.u32 (%p2282_p3), 1, %s2171_s14  }
  0x3f   : > { %s1715_s27 = sshll.u32 (%p2282_p3), %s2179_s16, 4  ;;  %s1657_s30 = sshll.u32 (%p2282_p3), %s350_s26, 8 }
  0x40   : > { %s2354_s19 = scalar_lea.vmem (%p2282_p3), %s2892_s6, %s1715_s27  ;;  %s2359_s21 = scalar_lea.vmem (%p2282_p3), [#allocation7], %s1657_s30 }
  0x41   : > { %v369_v0 = vld [vmem:[%s2354_s19] sm:$0xff] (%p2282_p3)  ;;  %v371_v1 = vld [vmem:[%s2354_s19 + $0x8] sm:$0xff] (%p2282_p3) }
  0x42   : > { %v373_v2 = vld [vmem:[%s2354_s19 + $0x20] sm:$0xff] (%p2282_p3)  ;;  %370 = vst [vmem:[%s2359_s21] sm:$0xff] (%p2282_p3), %v369_v0  ;;  %372 = vst [vmem:[%s2359_s21 + $0x8] sm:$0xff] (%p2282_p3), %v371_v1  ;;  %v375_v3 = vld [vmem:[%s2354_s19 + $0x28] sm:$0xff] (%p2282_p3) }
  0x43   : > { %374 = vst [vmem:[%s2359_s21 + $0x10] sm:$0xff] (%p2282_p3), %v373_v2  ;;  %v377_v4 = vld [vmem:[%s2354_s19 + $0x40] sm:$0xff] (%p2282_p3)  ;;  %v379_v5 = vld [vmem:[%s2354_s19 + $0x48] sm:$0xff] (%p2282_p3)  ;;  %376 = vst [vmem:[%s2359_s21 + $0x18] sm:$0xff] (%p2282_p3), %v375_v3 }
  0x44   : > { %378 = vst [vmem:[%s2359_s21 + $0x20] sm:$0xff] (%p2282_p3), %v377_v4  ;;  %380 = vst [vmem:[%s2359_s21 + $0x28] sm:$0xff] (%p2282_p3), %v379_v5  ;;  %v381_v6 = vld [vmem:[%s2354_s19 + $0x60] sm:$0xff] (%p2282_p3)  ;;  %v383_v7 = vld [vmem:[%s2354_s19 + $0x68] sm:$0xff] (%p2282_p3) }
  0x45   : > { %v385_v8 = vld [vmem:[%s2354_s19 + $0x80] sm:$0xff]  ;;  %382 = vst [vmem:[%s2359_s21 + $0x30] sm:$0xff] %v381_v6  ;;  %384 = vst [vmem:[%s2359_s21 + $0x38] sm:$0xff] %v383_v7  ;;  %v387_v9 = vld [vmem:[%s2354_s19 + $0x88] sm:$0xff] }
  0x46   : > { %386 = vst [vmem:[%s2359_s21 + $0x40] sm:$0xff] %v385_v8  ;;  %v389_v10 = vld [vmem:[%s2354_s19 + $0xa0] sm:$0xff]  ;;  %v391_v11 = vld [vmem:[%s2354_s19 + $0xa8] sm:$0xff]  ;;  %388 = vst [vmem:[%s2359_s21 + $0x48] sm:$0xff] %v387_v9 }
  0x47   : > { %390 = vst [vmem:[%s2359_s21 + $0x50] sm:$0xff] %v389_v10  ;;  %392 = vst [vmem:[%s2359_s21 + $0x58] sm:$0xff] %v391_v11  ;;  %v393_v12 = vld [vmem:[%s2354_s19 + $0xc0] sm:$0xff]  ;;  %v395_v13 = vld [vmem:[%s2354_s19 + $0xc8] sm:$0xff] }
  0x48   : > { %v397_v14 = vld [vmem:[%s2354_s19 + $0xe0] sm:$0xff]  ;;  %394 = vst [vmem:[%s2359_s21 + $0x60] sm:$0xff] %v393_v12  ;;  %396 = vst [vmem:[%s2359_s21 + $0x68] sm:$0xff] %v395_v13  ;;  %v399_v15 = vld [vmem:[%s2354_s19 + $0xe8] sm:$0xff] }
  0x49   : > { %398 = vst [vmem:[%s2359_s21 + $0x70] sm:$0xff] %v397_v14  ;;  %v401_v16 = vld [vmem:[%s2354_s19 + $0x100] sm:$0xff]  ;;  %v403_v17 = vld [vmem:[%s2354_s19 + $0x108] sm:$0xff]  ;;  %400 = vst [vmem:[%s2359_s21 + $0x78] sm:$0xff] %v399_v15 }
  0x4a   : > { %402 = vst [vmem:[%s2359_s21 + $0x80] sm:$0xff] %v401_v16  ;;  %404 = vst [vmem:[%s2359_s21 + $0x88] sm:$0xff] %v403_v17  ;;  %v405_v18 = vld [vmem:[%s2354_s19 + $0x120] sm:$0xff]  ;;  %v407_v19 = vld [vmem:[%s2354_s19 + $0x128] sm:$0xff] }
  0x4b   : > { %v409_v20 = vld [vmem:[%s2354_s19 + $0x140] sm:$0xff]  ;;  %406 = vst [vmem:[%s2359_s21 + $0x90] sm:$0xff] %v405_v18  ;;  %408 = vst [vmem:[%s2359_s21 + $0x98] sm:$0xff] %v407_v19  ;;  %v411_v21 = vld [vmem:[%s2354_s19 + $0x148] sm:$0xff] }
  0x4c   : > { %410 = vst [vmem:[%s2359_s21 + $0xa0] sm:$0xff] %v409_v20  ;;  %v413_v22 = vld [vmem:[%s2354_s19 + $0x160] sm:$0xff]  ;;  %v415_v23 = vld [vmem:[%s2354_s19 + $0x168] sm:$0xff]  ;;  %412 = vst [vmem:[%s2359_s21 + $0xa8] sm:$0xff] %v411_v21 }
  0x4d   : > { %414 = vst [vmem:[%s2359_s21 + $0xb0] sm:$0xff] %v413_v22  ;;  %416 = vst [vmem:[%s2359_s21 + $0xb8] sm:$0xff] %v415_v23  ;;  %v417_v24 = vld [vmem:[%s2354_s19 + $0x180] sm:$0xff]  ;;  %v419_v25 = vld [vmem:[%s2354_s19 + $0x188] sm:$0xff] }
  0x4e   : > { %v421_v26 = vld [vmem:[%s2354_s19 + $0x1a0] sm:$0xff]  ;;  %418 = vst [vmem:[%s2359_s21 + $0xc0] sm:$0xff] %v417_v24  ;;  %420 = vst [vmem:[%s2359_s21 + $0xc8] sm:$0xff] %v419_v25  ;;  %v423_v27 = vld [vmem:[%s2354_s19 + $0x1a8] sm:$0xff] }
  0x4f   : > { %422 = vst [vmem:[%s2359_s21 + $0xd0] sm:$0xff] %v421_v26  ;;  %v425_v28 = vld [vmem:[%s2354_s19 + $0x1c0] sm:$0xff]  ;;  %v427_v29 = vld [vmem:[%s2354_s19 + $0x1c8] sm:$0xff]  ;;  %424 = vst [vmem:[%s2359_s21 + $0xd8] sm:$0xff] %v423_v27 }
  0x50   : > { %426 = vst [vmem:[%s2359_s21 + $0xe0] sm:$0xff] %v425_v28  ;;  %428 = vst [vmem:[%s2359_s21 + $0xe8] sm:$0xff] %v427_v29  ;;  %v429_v30 = vld [vmem:[%s2354_s19 + $0x1e0] sm:$0xff]  ;;  %v431_v31 = vld [vmem:[%s2354_s19 + $0x1e8] sm:$0xff] }
  0x51   : > { %430 = vst [vmem:[%s2359_s21 + $0xf0] sm:$0xff] %v429_v30  ;;  %432 = vst [vmem:[%s2359_s21 + $0xf8] sm:$0xff] %v431_v31 }
  0x52 PF: > { %452 = sbr.rel (%p2290_p7) target bundleno = 1209 (0x4b9), region = 71  ;;  %p2907_p3 = scmp.ne.s32.totalorder (!%p2290_p7), %s2904_s24, 0 }
  0x59   : > { %2158 = dma.done.wait (%p2907_p3), [#allocation5], 16  }
  0x5a   : > { %2160 = vsyncadd (%p2907_p3), [#allocation5], 4294967280 }
  0x5b   : > { %2162 = dma.done.wait (%p2907_p3), [#allocation4], 12288  }
  0x5c   : > { %2164 = vsyncadd (%p2907_p3), [#allocation4], 4294955008  ;;  %s463_s19 = sand.u32 1, %s2167_s13  }
  0x5d   : > { %s1663_s29 = sshll.u32 %s463_s19, 8 }
  0x5e   : > { %s2433_s11 = scalar_lea.vmem [#allocation7], %s1663_s29 }
  0x5f   : > { %469 = sfence }
  0x60   : > { %v593_v32 = vld [vmem:[#allocation6 + $0x80] sm:$0xff]  ;;  %v594_v33 = vld [vmem:[#allocation6 + $0x88] sm:$0xff]  ;;  %v595_v43 = vld [vmem:[#allocation6 + $0x90] sm:$0xff]  ;;  %s550_s21 = sld [smem:[#allocation3]]  ;;  %s1672_s19 = sld [smem:[#allocation3 + $0x2]]  ;;  %vm944_vm5 = vcmask 7168  }
  0x61   : > { %v577_v34 = vld [vmem:[#allocation6] sm:$0xff]  ;;  %v1824_v35 = vpack.c.bf16 %v594_v33, %v593_v32  ;;  %v578_v36 = vld [vmem:[#allocation6 + $0x8] sm:$0xff]  ;;  %v596_v45 = vld [vmem:[#allocation6 + $0x98] sm:$0xff]  ;;  %s1673_s29 = sld [smem:[#allocation3 + $0x1]]  ;;  %s1674_s13 = sld [smem:[#allocation3 + $0x3]] }
  0x62   : > { %v625_v37 = vld [vmem:[#allocation6 + $0x180] sm:$0xff]  ;;  %v626_v38 = vld [vmem:[#allocation6 + $0x188] sm:$0xff]  ;;  %v1826_v39 = vpack.c.bf16 %v578_v36, %v577_v34  ;;  %v579_v46 = vld [vmem:[#allocation6 + $0x10] sm:$0xff]  ;;  %v1828_v48 = vpack.c.bf16 %v596_v45, %v595_v43  ;;  %s2189_s0 = smov 64   ;;  %s1675_s28 = sld [smem:[#allocation3 + $0x4]] }
  0x63   : > { %v1856_v40 = vpack.c.bf16 %v626_v38, %v625_v37  ;;  %v609_v41 = vld [vmem:[#allocation6 + $0x100] sm:$0xff]  ;;  %v610_v42 = vld [vmem:[#allocation6 + $0x108] sm:$0xff]  ;;  %1825 = vmatprep.subr.bf16.mxu0 %v1824_v35  ;;  %v580_v47 = vld [vmem:[#allocation6 + $0x18] sm:$0xff]  ;;  %s1664_s23 = sshll.u32 %s2175_s15, 2  ;;  %p527_p8 = scmp.lt.s32.totalorder %s2175_s15, 1 }
  0x64   : > { %v1858_v44 = vpack.c.bf16 %v610_v42, %v609_v41  ;;  %1827 = vmatpush3.bf16.msra.mxu0 %v1826_v39  ;;  %v1830_v49 = vpack.c.bf16 %v580_v47, %v579_v46  ;;  %v627_v50 = vld [vmem:[#allocation6 + $0x190] sm:$0xff]  ;;  %v628_v51 = vld [vmem:[#allocation6 + $0x198] sm:$0xff]  ;;  %v597_v55 = vld [vmem:[#allocation6 + $0xa0] sm:$0xff]  ;;  %p521_p7 = scmp.lt.s32.totalorder %s1664_s23, 7 }
  0x65   : > { %1857 = vmatprep.subr.bf16.mxu1 %v1856_v40  ;;  %v611_v52 = vld [vmem:[#allocation6 + $0x110] sm:$0xff]  ;;  %v1860_v53 = vpack.c.bf16 %v628_v51, %v627_v50  ;;  %v612_v54 = vld [vmem:[#allocation6 + $0x118] sm:$0xff]  ;;  %v598_v56 = vld [vmem:[#allocation6 + $0xa8] sm:$0xff]  ;;  %1829 = vmatprep.subr.bf16.mxu0 %v1828_v48 }
  0x66   : > { %1859 = vmatpush3.bf16.msra.mxu1 %v1858_v44  ;;  %v1862_v57 = vpack.c.bf16 %v612_v54, %v611_v52  ;;  %v1832_v58 = vpack.c.bf16 %v598_v56, %v597_v55  ;;  %v581_v59 = vld [vmem:[#allocation6 + $0x20] sm:$0xff]  ;;  %v582_v60 = vld [vmem:[#allocation6 + $0x28] sm:$0xff]  ;;  %v599_v3 = vld [vmem:[#allocation6 + $0xb0] sm:$0xff]  ;;  %s2916_s23 = smov (!%p521_p7, %s1664_s23), 7 }
  0x67   : > { %v629_v61 = vld [vmem:[#allocation6 + $0x1a0] sm:$0xff]  ;;  %1861 = vmatprep.subr.bf16.mxu1 %v1860_v53  ;;  %v630_v62 = vld [vmem:[#allocation6 + $0x1a8] sm:$0xff]  ;;  %v1834_v1 = vpack.c.bf16 %v582_v60, %v581_v59  ;;  %v600_v4 = vld [vmem:[#allocation6 + $0xb8] sm:$0xff]  ;;  %s1665_s24 = sshll.u32 %s2916_s23, 3 }
  0x68   : > { %v613_v63 = vld [vmem:[#allocation6 + $0x120] sm:$0xff]  ;;  %v614_v0 = vld [vmem:[#allocation6 + $0x128] sm:$0xff]  ;;  %1831 = vmatpush3.bf16.msra.mxu0 %v1830_v49  ;;  %v1864_v2 = vpack.c.bf16 %v630_v62, %v629_v61  ;;  %v583_v5 = vld [vmem:[#allocation6 + $0x30] sm:$0xff]  ;;  %v1836_v7 = vpack.c.bf16 %v600_v4, %v599_v3  ;;  %s2650_s20 = scalar_lea.vmem %s2893_s7, %s1665_s24 }
  0x69   : > { %1833 = vmatprep.subr.bf16.mxu0 %v1832_v58  ;;  %v1866_v6 = vpack.c.bf16 %v614_v0, %v613_v63  ;;  %v584_v8 = vld [vmem:[#allocation6 + $0x38] sm:$0xff]  ;;  %v631_v9 = vld [vmem:[#allocation6 + $0x1b0] sm:$0xff]  ;;  %v601_v14 = vld [vmem:[#allocation6 + $0xc0] sm:$0xff] }
  0x6a   : > { %1863 = vmatpush3.bf16.msra.mxu1 %v1862_v57  ;;  %v632_v10 = vld [vmem:[#allocation6 + $0x1b8] sm:$0xff]  ;;  %v615_v12 = vld [vmem:[#allocation6 + $0x130] sm:$0xff]  ;;  %v602_v15 = vld [vmem:[#allocation6 + $0xc8] sm:$0xff]  ;;  %v1838_v16 = vpack.c.bf16 %v584_v8, %v583_v5 }
  0x6b   : > { %1865 = vmatprep.subr.bf16.mxu1 %v1864_v2  ;;  %v1868_v11 = vpack.c.bf16 %v632_v10, %v631_v9  ;;  %v616_v13 = vld [vmem:[#allocation6 + $0x138] sm:$0xff]  ;;  %v633_v17 = vld [vmem:[#allocation6 + $0x1c0] sm:$0xff]  ;;  %v634_v18 = vld [vmem:[#allocation6 + $0x1c8] sm:$0xff]  ;;  %v1840_v20 = vpack.c.bf16 %v602_v15, %v601_v14 }
  0x6c   : > { %1835 = vmatpush3.bf16.msra.mxu0 %v1834_v1  ;;  %v1870_v19 = vpack.c.bf16 %v616_v13, %v615_v12  ;;  %v585_v21 = vld [vmem:[#allocation6 + $0x40] sm:$0xff]  ;;  %v586_v22 = vld [vmem:[#allocation6 + $0x48] sm:$0xff]  ;;  %v1872_v24 = vpack.c.bf16 %v634_v18, %v633_v17  ;;  %v603_v26 = vld [vmem:[#allocation6 + $0xd0] sm:$0xff] }
  0x6d   : > { %1837 = vmatprep.subr.bf16.mxu0 %v1836_v7  ;;  %v617_v23 = vld [vmem:[#allocation6 + $0x140] sm:$0xff]  ;;  %v618_v25 = vld [vmem:[#allocation6 + $0x148] sm:$0xff]  ;;  %v604_v27 = vld [vmem:[#allocation6 + $0xd8] sm:$0xff]  ;;  %v1842_v30 = vpack.c.bf16 %v586_v22, %v585_v21 }
  0x6e   : > { %1867 = vmatpush3.bf16.msra.mxu1 %v1866_v6  ;;  %v635_v28 = vld [vmem:[#allocation6 + $0x1d0] sm:$0xff]  ;;  %v636_v29 = vld [vmem:[#allocation6 + $0x1d8] sm:$0xff]  ;;  %v1874_v31 = vpack.c.bf16 %v618_v25, %v617_v23  ;;  %v1844_v32 = vpack.c.bf16 %v604_v27, %v603_v26  ;;  %v605_v38 = vld [vmem:[#allocation6 + $0xe0] sm:$0xff] }
  0x6f   : > { %1869 = vmatprep.subr.bf16.mxu1 %v1868_v11  ;;  %v587_v33 = vld [vmem:[#allocation6 + $0x50] sm:$0xff]  ;;  %v588_v34 = vld [vmem:[#allocation6 + $0x58] sm:$0xff]  ;;  %v1876_v36 = vpack.c.bf16 %v636_v29, %v635_v28  ;;  %v606_v39 = vld [vmem:[#allocation6 + $0xe8] sm:$0xff] }
  0x70   : > { %1839 = vmatpush3.bf16.msra.mxu0 %v1838_v16  ;;  %v619_v35 = vld [vmem:[#allocation6 + $0x150] sm:$0xff]  ;;  %v620_v37 = vld [vmem:[#allocation6 + $0x158] sm:$0xff]  ;;  %v637_v40 = vld [vmem:[#allocation6 + $0x1e0] sm:$0xff]  ;;  %v1846_v42 = vpack.c.bf16 %v588_v34, %v587_v33  ;;  %v1848_v46 = vpack.c.bf16 %v606_v39, %v605_v38 }
  0x71   : > { %1841 = vmatprep.subr.bf16.mxu0 %v1840_v20  ;;  %v638_v41 = vld [vmem:[#allocation6 + $0x1e8] sm:$0xff]  ;;  %v589_v43 = vld [vmem:[#allocation6 + $0x60] sm:$0xff]  ;;  %v1878_v45 = vpack.c.bf16 %v620_v37, %v619_v35  ;;  %v607_v51 = vld [vmem:[#allocation6 + $0xf0] sm:$0xff] }
  0x72   : > { %1871 = vmatpush3.bf16.msra.mxu1 %v1870_v19  ;;  %v572_v44 = vld [vmem:[%s2887_s1 + $0x8] sm:$0xff]  ;;  %v621_v48 = vld [vmem:[#allocation6 + $0x160] sm:$0xff]  ;;  %v1880_v50 = vpack.c.bf16 %v638_v41, %v637_v40  ;;  %v608_v52 = vld [vmem:[#allocation6 + $0xf8] sm:$0xff] }
  0x73   : > { %1873 = vmatprep.subr.bf16.mxu1 %v1872_v24  ;;  %v590_v47 = vld [vmem:[#allocation6 + $0x68] sm:$0xff]  ;;  %744 = vmatprep.mubr.f32.mxu0 %v572_v44  ;;  %v574_v53 = vld [vmem:[%s2887_s1 + $0x18] sm:$0xff]  ;;  %v639_v54 = vld [vmem:[#allocation6 + $0x1f0] sm:$0xff]  ;;  %v1852_v58 = vpack.c.bf16 %v608_v52, %v607_v51 }
  0x74   : > { %1843 = vmatpush3.bf16.msra.mxu0 %v1842_v30  ;;  %v622_v49 = vld [vmem:[#allocation6 + $0x168] sm:$0xff]  ;;  %v640_v55 = vld [vmem:[#allocation6 + $0x1f8] sm:$0xff]  ;;  %814 = vmatprep.mubr.f32.mxu1 %v574_v53  ;;  %v1850_v56 = vpack.c.bf16 %v590_v47, %v589_v43  ;;  %v591_v59 = vld [vmem:[#allocation6 + $0x70] sm:$0xff] }
  0x75   : > { %1845 = vmatprep.subr.bf16.mxu0 %v1844_v32  ;;  %v1882_v57 = vpack.c.bf16 %v622_v49, %v621_v48  ;;  %v592_v60 = vld [vmem:[#allocation6 + $0x78] sm:$0xff]  ;;  %v623_v61 = vld [vmem:[#allocation6 + $0x170] sm:$0xff]  ;;  %v1884_v62 = vpack.c.bf16 %v640_v55, %v639_v54  ;;  %v657_v0 = vld [vmem:[#allocation6 + $0x280] sm:$0xff]  ;;  %v547_v54 = vlaneseq }
  0x76   : > { %1875 = vmatpush3.bf16.msra.mxu1 %v1874_v31  ;;  %v624_v63 = vld [vmem:[#allocation6 + $0x178] sm:$0xff]  ;;  %v658_v1 = vld [vmem:[#allocation6 + $0x288] sm:$0xff]  ;;  %v1854_v2 = vpack.c.bf16 %v592_v60, %v591_v59  ;;  %v641_v5 = vld [vmem:[#allocation6 + $0x200] sm:$0xff]  ;;  %v557_v60 = vstv %s1673_s29  ;;  %s2573_s29 = sld [smem:[#allocation3 + $0x7]] }
  0x77   : > { %1877 = vmatprep.subr.bf16.mxu1 %v1876_v36  ;;  %v1886_v3 = vpack.c.bf16 %v624_v63, %v623_v61  ;;  %v1888_v4 = vpack.c.bf16 %v658_v1, %v657_v0  ;;  %v642_v6 = vld [vmem:[#allocation6 + $0x208] sm:$0xff]  ;;  %v659_v7 = vld [vmem:[#allocation6 + $0x290] sm:$0xff]  ;;  %v660_v8 = vld [vmem:[#allocation6 + $0x298] sm:$0xff]  ;;  %v2453_v55 = vand.u32 127, %v547_v54  ;;  %v558_v61 = vstv %s1674_s13  ;;  %s1680_s13 = sshll.u32 %s2175_s15, 9  ;;  %s2918_s15 = smov (!%p527_p8, %s2175_s15), 1 }
  0x78   : > { %1847 = vmatpush3.bf16.msra.mxu0 %v1846_v42  ;;  %v571_v9 = vld [vmem:[%s2887_s1] sm:$0xff]  ;;  %v1890_v10 = vpack.c.bf16 %v642_v6, %v641_v5  ;;  %v573_v11 = vld [vmem:[%s2887_s1 + $0x10] sm:$0xff]  ;;  %v644_v13 = vld [vmem:[#allocation6 + $0x218] sm:$0xff]  ;;  %v1892_v14 = vpack.c.bf16 %v660_v8, %v659_v7  ;;  %s2681_s22 = sshll.u32 %s2918_s15, 5 }
  0x79   : > { %1849 = vmatprep.subr.bf16.mxu0 %v1848_v46  ;;  %v643_v12 = vld [vmem:[#allocation6 + $0x210] sm:$0xff]  ;;  %v661_v15 = vld [vmem:[#allocation6 + $0x2a0] sm:$0xff]  ;;  %v662_v16 = vld [vmem:[#allocation6 + $0x2a8] sm:$0xff]  ;;  %vm549_vm0 = vcmp.lt.s32.totalorder %v2453_v55, 64  ;;  %s2687_s30 = scalar_lea.vmem %s2894_s8, %s2681_s22  ;;  %s2725_s12 = scalar_lea.vmem %s2895_s9, %s2681_s22 }
  0x7a   : > { %1879 = vmatpush3.bf16.msra.mxu1 %v1878_v45  ;;  %v576_v17 = vld [vmem:[%s2887_s1 + $0x28] sm:$0xff]  ;;  %v645_v18 = vld [vmem:[#allocation6 + $0x220] sm:$0xff]  ;;  %v1894_v20 = vpack.c.bf16 %v644_v13, %v643_v12  ;;  %v663_v21 = vld [vmem:[#allocation6 + $0x2b0] sm:$0xff]  ;;  %v1896_v23 = vpack.c.bf16 %v662_v16, %v661_v15  ;;  %v559_v63 = vsel %vm549_vm0, %v557_v60, %v558_v61 }
  0x7b   : > { %1881 = vmatprep.subr.bf16.mxu1 %v1880_v50  ;;  %v646_v19 = vld [vmem:[#allocation6 + $0x228] sm:$0xff]  ;;  %v664_v22 = vld [vmem:[#allocation6 + $0x2b8] sm:$0xff]  ;;  %v647_v24 = vld [vmem:[#allocation6 + $0x230] sm:$0xff] }
  0x7c   : > { %1851 = vmatpush3.bf16.msra.mxu0 %v1850_v56  ;;  %v648_v25 = vld [vmem:[#allocation6 + $0x238] sm:$0xff]  ;;  %v1898_v26 = vpack.c.bf16 %v646_v19, %v645_v18  ;;  %v665_v27 = vld [vmem:[#allocation6 + $0x2c0] sm:$0xff]  ;;  %v666_v28 = vld [vmem:[#allocation6 + $0x2c8] sm:$0xff]  ;;  %v1900_v29 = vpack.c.bf16 %v664_v22, %v663_v21  ;;  %v552_v56 = vstv %s550_s21  ;;  %s1676_s21 = sld [smem:[#allocation3 + $0x6]] }
  0x7d   : > { %1853 = vmatprep.subr.bf16.mxu0 %v1852_v58  ;;  %v1902_v30 = vpack.c.bf16 %v648_v25, %v647_v24  ;;  %v1904_v31 = vpack.c.bf16 %v666_v28, %v665_v27  ;;  %v649_v32 = vld [vmem:[#allocation6 + $0x240] sm:$0xff]  ;;  %v650_v33 = vld [vmem:[#allocation6 + $0x248] sm:$0xff]  ;;  %v667_v34 = vld [vmem:[#allocation6 + $0x2d0] sm:$0xff] }
  0x7e   : > { %1883 = vmatpush3.bf16.msra.mxu1 %v1882_v57  ;;  %v668_v35 = vld [vmem:[#allocation6 + $0x2d8] sm:$0xff]  ;;  %v1906_v36 = vpack.c.bf16 %v650_v33, %v649_v32  ;;  %v651_v38 = vld [vmem:[#allocation6 + $0x250] sm:$0xff]  ;;  %v669_v40 = vld [vmem:[#allocation6 + $0x2e0] sm:$0xff]  ;;  %v553_v57 = vstv %s1672_s19  ;;  %s2571_s19 = sld [smem:[#allocation3 + $0x5]] }
  0x7f   : > { %1885 = vmatprep.subr.bf16.mxu1 %v1884_v62  ;;  %v1908_v37 = vpack.c.bf16 %v668_v35, %v667_v34  ;;  %v652_v39 = vld [vmem:[#allocation6 + $0x258] sm:$0xff]  ;;  %v670_v41 = vld [vmem:[#allocation6 + $0x2e8] sm:$0xff]  ;;  %v653_v44 = vld [vmem:[#allocation6 + $0x260] sm:$0xff]  ;;  %v554_v58 = vsel %vm549_vm0, %v552_v56, %v553_v57  ;;  %v2191_v56 = vmov 1.0  }
  0x80   : > { %1855 = vmatpush3.bf16.msra.mxu0 %v1854_v2  ;;  %v1910_v42 = vpack.c.bf16 %v652_v39, %v651_v38  ;;  %v1912_v43 = vpack.c.bf16 %v670_v41, %v669_v40  ;;  %v654_v45 = vld [vmem:[#allocation6 + $0x268] sm:$0xff]  ;;  %v671_v46 = vld [vmem:[#allocation6 + $0x2f0] sm:$0xff]  ;;  %v672_v47 = vld [vmem:[#allocation6 + $0x2f8] sm:$0xff]  ;;  %v570_v57 = vsel %vm549_vm0, -1.0, %v2191_v56 }
  0x81   : > { %1889 = vmatprep.subr.bf16.mxu0 %v1888_v4  ;;  %v1914_v48 = vpack.c.bf16 %v654_v45, %v653_v44  ;;  %v1916_v49 = vpack.c.bf16 %v672_v47, %v671_v46  ;;  %v655_v50 = vld [vmem:[#allocation6 + $0x270] sm:$0xff]  ;;  %v656_v51 = vld [vmem:[#allocation6 + $0x278] sm:$0xff]  ;;  %v575_v53 = vld [vmem:[%s2887_s1 + $0x20] sm:$0xff] }
  0x82   : > { %1887 = vmatpush3.bf16.msra.mxu1 %v1886_v3  ;;  %v1918_v52 = vpack.c.bf16 %v656_v51, %v655_v50  ;;  %v893_v59 = vld [vmem:[%s2890_s4] sm:$0xff]  ;;  %v2470_v1 = vld [vmem:[%s2891_s5 + $0x8] sm:$0xff] }
  0x83   : > { %745 = vmatmul.mubr.f32.vlgmr.msra.gmra.mrb[0].mxu0 %v571_v9  ;;  %v894_v62 = vmul.f32 %v893_v59, %v554_v58  ;;  %v2006_v2 = vld [vmem:[%s2433_s11] ss:$16 sps:$4 sm:$0xff]   ;;  %v2008_v3 = vld [vmem:[%s2433_s11 + $0x4] ss:$16 sps:$4 sm:$0xff]   ;;  %v2477_v4 = vld [vmem:[%s2433_s11 + $0x8] ss:$16 sps:$4 sm:$0xff]  }
  0x84   : > { %1891 = vmatpush3.bf16.msra.mxu0 %v1890_v10  ;;  %884 = vmatprep.mubr.f32.mxu0 %v576_v17  ;;  %v2480_v5 = vld [vmem:[%s2433_s11 + $0xc] ss:$16 sps:$4 sm:$0xff]   ;;  %v2014_v6 = vld [vmem:[%s2433_s11 + $0x24] ss:$16 sps:$4 sm:$0xff]   ;;  %v2012_v8 = vld [vmem:[%s2433_s11 + $0x20] ss:$16 sps:$4 sm:$0xff]  }
  0x85   : > { %815 = vmatmul.mubr.f32.vlgmr.msra.gmra.mrb[0].mxu1 %v573_v11  ;;  %1893 = vmatprep.subr.bf16.mxu0 %v1892_v14  ;;  %v2463_v0 = vadd.f32 %v894_v62, %v559_v63  ;;  %v2484_v7 = vld [vmem:[%s2433_s11 + $0x2c] ss:$16 sps:$4 sm:$0xff]   ;;  %v2490_v9 = vld [vmem:[%s2433_s11 + $0x28] ss:$16 sps:$4 sm:$0xff]   ;;  %v2020_v10 = vld [vmem:[%s2433_s11 + $0x44] ss:$16 sps:$4 sm:$0xff]   ;;  %v562_v63 = vstv %s1675_s28 }
  0x86   : > { %1171 = vmatprep.subr.bf16.mxu1 %v2008_v3  ;;  %v2495_v11 = vld [vmem:[%s2433_s11 + $0x4c] ss:$16 sps:$4 sm:$0xff]   ;;  %v2018_v12 = vld [vmem:[%s2433_s11 + $0x40] ss:$16 sps:$4 sm:$0xff]   ;;  %v2500_v13 = vld [vmem:[%s2433_s11 + $0x48] ss:$16 sps:$4 sm:$0xff]  }
  0x87   : > { %896 = vrot.lane.b32.xlu1 %v2463_v0, %s2189_s0  ;;  %1172 = vmatpush1.bf16.msra.mxu1 %v2006_v2  ;;  %v2026_v14 = vld [vmem:[%s2433_s11 + $0x64] ss:$16 sps:$4 sm:$0xff]   ;;  %v2505_v15 = vld [vmem:[%s2433_s11 + $0x6c] ss:$16 sps:$4 sm:$0xff]   ;;  %v2024_v16 = vld [vmem:[%s2433_s11 + $0x60] ss:$16 sps:$4 sm:$0xff]  }
  0x88   : > { %1895 = vmatpush3.bf16.msra.mxu0 %v1894_v20  ;;  %1173 = vmatprep.subr.bf16.mxu1 %v2014_v6  ;;  %v2510_v17 = vld [vmem:[%s2433_s11 + $0x68] ss:$16 sps:$4 sm:$0xff]   ;;  %v1679_v19 = vld [vmem:[%s2889_s3] ss:$0 sm:$0xff]  ;;  %v2032_v27 = vld [vmem:[%s2433_s11 + $0x84] ss:$16 sps:$4 sm:$0xff]   ;;  %v563_v2 = vstv %s1676_s21 }
  0x89   : > { %1897 = vmatprep.subr.bf16.mxu0 %v1896_v23  ;;  %v2030_v28 = vld [vmem:[%s2433_s11 + $0x80] ss:$16 sps:$4 sm:$0xff]   ;;  %v2530_v33 = vld [vmem:[%s2433_s11 + $0xac] ss:$16 sps:$4 sm:$0xff]   ;;  %v2533_v34 = vld [vmem:[%s2433_s11 + $0xa8] ss:$16 sps:$4 sm:$0xff]  }
  0x8a   : > { %v2036_v32 = vld [vmem:[%s2433_s11 + $0xa0] ss:$16 sps:$4 sm:$0xff]   ;;  %v2044_v35 = vld [vmem:[%s2433_s11 + $0xc4] ss:$16 sps:$4 sm:$0xff]   ;;  %v2540_v38 = vld [vmem:[%s2433_s11 + $0xcc] ss:$16 sps:$4 sm:$0xff]  }
  0x8b   : > { %902 = vrot.lane.b32.xlu1 %v2470_v1, %s2189_s0  ;;  %1174 = vmatpush1.bf16.msra.mxu1 %v2012_v8  ;;  %v2543_v40 = vld [vmem:[%s2433_s11 + $0xc8] ss:$16 sps:$4 sm:$0xff]   ;;  %v2048_v44 = vld [vmem:[%s2433_s11 + $0xe0] ss:$16 sps:$4 sm:$0xff]   ;;  %v2550_v45 = vld [vmem:[%s2433_s11 + $0xec] ss:$16 sps:$4 sm:$0xff]  }
  0x8c   : > { %1899 = vmatpush3.bf16.msra.mxu0 %v1898_v26  ;;  %1175 = vmatprep.subr.bf16.mxu1 %v2020_v10  ;;  %v2553_v46 = vld [vmem:[%s2433_s11 + $0xe8] ss:$16 sps:$4 sm:$0xff]   ;;  %v890_v47 = vld [vmem:[%s2891_s5] sm:$0xff] }
  0x8d   : > { %1901 = vmatprep.subr.bf16.mxu0 %v1900_v29  ;;  %v2520_v29 = vld [vmem:[%s2433_s11 + $0x8c] ss:$16 sps:$4 sm:$0xff]  }
  0x8f   : > { %1176 = vmatpush1.bf16.msra.mxu1 %v2018_v12 }
  0x90   : > { %1903 = vmatpush3.bf16.msra.mxu0 %v1902_v30  ;;  %1177 = vmatprep.subr.bf16.mxu1 %v2026_v14  ;;  %v2523_v30 = vld [vmem:[%s2433_s11 + $0x88] ss:$16 sps:$4 sm:$0xff]   ;;  %v564_v14 = vsel %vm549_vm0, %v562_v63, %v563_v2 }
  0x91   : > { %1905 = vmatprep.subr.bf16.mxu0 %v1904_v31  ;;  %v2038_v31 = vld [vmem:[%s2433_s11 + $0xa4] ss:$16 sps:$4 sm:$0xff]  }
  0x93   : > { %1178 = vmatpush1.bf16.msra.mxu1 %v2024_v16  ;;  %v567_v16 = vstv %s2571_s19  ;;  %s2801_s19 = scalar_lea.vmem %s2896_s10, %s2681_s22 }
  0x94   : > { %1907 = vmatpush3.bf16.msra.mxu0 %v1906_v36  ;;  %1179 = vmatprep.subr.bf16.mxu1 %v2032_v27 }
  0x95   : > { %1909 = vmatprep.subr.bf16.mxu0 %v1908_v37  ;;  %v2042_v37 = vld [vmem:[%s2433_s11 + $0xc0] ss:$16 sps:$4 sm:$0xff]  }
  0x97   : > { %1180 = vmatpush1.bf16.msra.mxu1 %v2030_v28 }
  0x98   : > { %1911 = vmatpush3.bf16.msra.mxu0 %v1910_v42  ;;  %1181 = vmatprep.subr.bf16.mxu1 %v2038_v31  ;;  %v2050_v42 = vld [vmem:[%s2433_s11 + $0xe4] ss:$16 sps:$4 sm:$0xff]  }
  0x99   : > { %1913 = vmatprep.subr.bf16.mxu0 %v1912_v43 }
  0x9b   : > { %1182 = vmatpush1.bf16.msra.mxu1 %v2036_v32 }
  0x9c   : > { %1915 = vmatpush3.bf16.msra.mxu0 %v1914_v48  ;;  %1183 = vmatprep.subr.bf16.mxu1 %v2044_v35  ;;  %v2190_v48 = vmov 0  }
  0x9d   : > { %1917 = vmatprep.subr.bf16.mxu0 %v1916_v49  ;;  %1203 = vmatprep.mubr.bf16.mxu1 %v2190_v48  ;;  %v892_v49 = vld [vmem:[%s2891_s5 + $0x10] sm:$0xff] }
  0x9e   : > { %2005 = vset.pattern.permute.xlu1 %v2190_v48  ;;  %2004 = vset.pattern.permute.xlu0 %v2190_v48 }
  0x9f   : > { %1184 = vmatpush1.bf16.msra.mxu1 %v2042_v37 }
  0xa0   : > { %1919 = vmatpush3.bf16.msra.mxu0 %v1918_v52  ;;  %1185 = vmatprep.subr.bf16.mxu1 %v2050_v42 }
  0xa1   : > { %1224 = vmatprep.subr.bf16.mxu0 %v2480_v5 }
  0xa3   : > { %885 = vmatmul.mubr.f32.vlgmr.msra.gmra.mrb[2].mxu0 %v575_v53  ;;  %1186 = vmatpush1.bf16.msra.mxu1 %v2048_v44 }
  0xa4   : > { %1225 = vmatpush1.bf16.msra.mxu0 %v2477_v4  ;;  %1920 = vmatprep.subr.bf16.mxu1 %v2480_v5 }
  0xa5   : > { %1226 = vmatprep.subr.bf16.mxu0 %v2484_v7  ;;  %1256 = vmatprep.mubr.bf16.mxu0 %v2190_v48 }
  0xa8   : > { %1227 = vmatpush1.bf16.msra.mxu0 %v2490_v9 }
  0xa9   : > { %1228 = vmatprep.subr.bf16.mxu0 %v2495_v11 }
  0xac   : > { %1229 = vmatpush1.bf16.msra.mxu0 %v2500_v13 }
  0xad   : > { %1230 = vmatprep.subr.bf16.mxu0 %v2505_v15 }
  0xb0   : > { %1231 = vmatpush1.bf16.msra.mxu0 %v2510_v17 }
  0xb1   : > { %1232 = vmatprep.subr.bf16.mxu0 %v2520_v29 }
  0xb4   : > { %1233 = vmatpush1.bf16.msra.mxu0 %v2523_v30 }
  0xb5   : > { %1234 = vmatprep.subr.bf16.mxu0 %v2530_v33 }
  0xb8   : > { %1235 = vmatpush1.bf16.msra.mxu0 %v2533_v34 }
  0xb9   : > { %1236 = vmatprep.subr.bf16.mxu0 %v2540_v38 }
  0xbc   : > { %1237 = vmatpush1.bf16.msra.mxu0 %v2543_v40 }
  0xbd   : > { %1238 = vmatprep.subr.bf16.mxu0 %v2550_v45 }
  0xc0   : > { %1239 = vmatpush1.bf16.msra.mxu0 %v2553_v46 }
  0xf9   : > { %v897_v50 = vpop.permute.xlu1 %896 }
  0xfd   : > { %v903_v51 = vpop.permute.xlu1 %902 }
  0xfe   : > { %v914_v59 = vsel %vm549_vm0, %v903_v51, %v2470_v1  ;;  %v910_v12 = vsel %vm549_vm0, %v2470_v1, %v903_v51 }
  0xff   : > { %v922_v6 = vmul.f32 %v914_v59, %v897_v50 }
 0x156   : > { %v1751_v18 = vpop.f32.mrb[0].mxu0 }
 0x157   : > { %v1752_v20 = vpop.f32.mrb[1].mxu0 }
 0x158   : > { %v1786_v21 = vpop.f32.mrb[0].mxu1  ;;  %v1753_v22 = vadd.f32 %v1752_v20, %v1751_v18  ;;  %v568_v18 = vstv %s2573_s29 }
 0x159   : > { %v1787_v23 = vpop.f32.mrb[1].mxu1  ;;  %v569_v31 = vsel %vm549_vm0, %v567_v16, %v568_v18 }
 0x15a   : > { %v1788_v24 = vadd.f32 %v1787_v23, %v1786_v21  ;;  %v747_v25 = vadd.f32 %v1753_v22, %v1679_v19  ;;  %v918_v22 = vmul.f32 %v910_v12, %v2463_v0  ;;  %v926_v23 = vmul.f32 %v922_v6, %v570_v57 }
 0x15c   : > { %v817_v26 = vadd.f32 %v1788_v24, %v747_v25  ;;  %v930_v37 = vadd.f32 %v926_v23, %v918_v22 }
 0x15e   : > { %v934_v44 = vmul.f32 %v930_v37, %v564_v14  ;;  %v2702_v37 = vld [vmem:[%s2650_s20 + $0x10] sm:$0xff] }
 0x176   : > { %v1821_v36 = vpop.f32.mrb[2].mxu0 }
 0x177   : > { %v1822_v39 = vpop.f32.mrb[3].mxu0 }
 0x178   : > { %v1823_v41 = vadd.f32 %v1822_v39, %v1821_v36 }
 0x17a   : > { %v887_v43 = vadd.f32 %v1823_v41, %v817_v26 }
 0x17c   : > { %898 = vrot.lane.b32.xlu0 %v887_v43, %s2189_s0 }
 0x180   : > { %900 = vrot.lane.b32.xlu0 %v890_v47, %s2189_s0 }
 0x184   : > { %904 = vrot.lane.b32.xlu0 %v892_v49, %s2189_s0 }
 0x1ee   : > { %v899_v52 = vpop.permute.xlu0 %898 }
 0x1ef   : > { %v908_v53 = vsel %vm549_vm0, %v887_v43, %v899_v52  ;;  %v912_v54 = vsel %vm549_vm0, %v899_v52, %v887_v43 }
 0x1f0   : > { %v920_v58 = vmul.f32 %v912_v54, %v897_v50  ;;  %v916_v60 = vmul.f32 %v908_v53, %v2463_v0 }
 0x1f2   : > { %v924_v61 = vmul.f32 %v920_v58, %v570_v57  ;;  %v901_v62 = vpop.permute.xlu0 %900 }
 0x1f3   : > { %v909_v3 = vsel %vm549_vm0, %v890_v47, %v901_v62  ;;  %v913_v5 = vsel %vm549_vm0, %v901_v62, %v890_v47  ;;  %v938_v47 = vadd.f32 %v934_v44, %v569_v31 }
 0x1f4   : > { %v928_v8 = vadd.f32 %v924_v61, %v916_v60  ;;  %v921_v10 = vmul.f32 %v913_v5, %v897_v50  ;;  %v917_v19 = vmul.f32 %v909_v3, %v2463_v0 }
 0x1f6   : > { %v925_v20 = vmul.f32 %v921_v10, %v570_v57  ;;  %v905_v21 = vpop.permute.xlu0 %904  ;;  %v932_v28 = vmul.f32 %v928_v8, %v564_v14 }
 0x1f7   : > { %v911_v24 = vsel %vm549_vm0, %v892_v49, %v905_v21  ;;  %v915_v25 = vsel %vm549_vm0, %v905_v21, %v892_v49 }
 0x1f8   : > { %v929_v26 = vadd.f32 %v925_v20, %v917_v19  ;;  %v919_v1 = vmul.f32 %v911_v24, %v2463_v0  ;;  %v923_v27 = vmul.f32 %v915_v25, %v897_v50  ;;  %v936_v41 = vadd.f32 %v932_v28, %v569_v31  ;;  %v2665_v20 = vld [vmem:[%s2650_s20 + $0x8] sm:$0xff] }
 0x1fa   : > { %v933_v32 = vmul.f32 %v929_v26, %v564_v14  ;;  %v927_v35 = vmul.f32 %v923_v27, %v570_v57 }
 0x1fc   : > { %v937_v36 = vadd.f32 %v933_v32, %v569_v31  ;;  %v931_v39 = vadd.f32 %v927_v35, %v919_v1 }
 0x1fe   : > { %v935_v42 = vmul.f32 %v931_v39, %v564_v14  ;;  %v940_v43 = vpack.c.bf16 %v937_v36, %v936_v41  ;;  %v2659_v14 = vld [vmem:[%s2650_s20] sm:$0xff] }
 0x200   : > { %1204 = vmatmul.mubr.bf16.vlgmr.msra.gmra.mrb[4].mxu1 %v940_v43  ;;  %1257 = vmatmul.mubr.bf16.vlgmr.msra.gmra.mrb[4].mxu0 %v940_v43  ;;  %v939_v0 = vadd.f32 %v935_v42, %v569_v31 }
 0x201   : > { %1928 = vmatpush1.bf16.msra.mxu1 %v2477_v4  ;;  %1213 = vmatprep.mubr.bf16.mxu1 %v2190_v48  ;;  %v964_v4 = vstv %s1680_s13 }
 0x202   : > { %1921 = vmatprep.subr.bf16.mxu1 %v2484_v7  ;;  %v941_v49 = vpack.c.bf16 %v939_v0, %v938_v47  ;;  %v961_v7 = vadd.s32 128, %v2453_v55 }
 0x205   : > { %1929 = vmatpush1.bf16.msra.mxu1 %v2490_v9  ;;  %v962_v9 = vadd.s32 256, %v2453_v55 }
 0x206   : > { %1922 = vmatprep.subr.bf16.mxu1 %v2495_v11  ;;  %v965_v11 = vadd.s32 %v964_v4, %v2453_v55 }
 0x208   : > { %1214 = vmatmul.mubr.bf16.gmra.mrb[8].mxu1 %v941_v49  ;;  %vm969_vm1 = vcmp.lt.s32.totalorder %v965_v11, 1000 }
 0x209   : > { %1930 = vmatpush1.bf16.msra.mxu1 %v2500_v13  ;;  %1266 = vmatprep.mubr.bf16.mxu1 %v2190_v48  ;;  %v966_v13 = vadd.s32 %v964_v4, %v961_v7 }
 0x20a   : > { %1923 = vmatprep.subr.bf16.mxu1 %v2505_v15  ;;  %v963_v15 = vadd.s32 384, %v2453_v55 }
 0x20b   : > { %vm970_vm2 = vcmp.lt.s32.totalorder %v966_v13, 1000 }
 0x20d   : > { %1931 = vmatpush1.bf16.msra.mxu1 %v2510_v17  ;;  %v967_v17 = vadd.s32 %v964_v4, %v962_v9 }
 0x20e   : > { %1924 = vmatprep.subr.bf16.mxu1 %v2520_v29  ;;  %v968_v29 = vadd.s32 %v964_v4, %v963_v15 }
 0x20f   : > { %vm971_vm3 = vcmp.lt.s32.totalorder %v967_v17, 1000 }
 0x210   : > { %vm972_vm4 = vcmp.lt.s32.totalorder %v968_v29, 1000 }
 0x211   : > { %1932 = vmatpush1.bf16.msra.mxu1 %v2523_v30  ;;  %v2192_v30 = vmov -1e+30  }
 0x212   : > { %1925 = vmatprep.subr.bf16.mxu1 %v2530_v33  ;;  %v973_v33 = vsel %vm969_vm1, 0.0, %v2192_v30  ;;  %v976_v53 = vsel %vm972_vm4, 0.0, %v2192_v30  ;;  %945 = vst.msk [vmem:[%s2687_s30] sm:$0xff] %vm944_vm5, %v2192_v30  ;;  %946 = vst.msk [vmem:[%s2687_s30 + $0x8] sm:$0xff] %vm944_vm5, %v2192_v30 }
 0x213   : > { %947 = vst.msk [vmem:[%s2687_s30 + $0x10] sm:$0xff] %vm944_vm5, %v2192_v30  ;;  %948 = vst.msk [vmem:[%s2687_s30 + $0x18] sm:$0xff] %vm944_vm5, %v2192_v30 }
 0x215   : > { %1933 = vmatpush1.bf16.msra.mxu1 %v2533_v34  ;;  %v974_v34 = vsel %vm970_vm2, 0.0, %v2192_v30 }
 0x216   : > { %1926 = vmatprep.subr.bf16.mxu1 %v2540_v38 }
 0x219   : > { %1934 = vmatpush1.bf16.msra.mxu1 %v2543_v40 }
 0x21a   : > { %1927 = vmatprep.subr.bf16.mxu1 %v2550_v45 }
 0x21d   : > { %1935 = vmatpush1.bf16.msra.mxu1 %v2553_v46  ;;  %v975_v46 = vsel %vm971_vm3, 0.0, %v2192_v30 }
 0x220   : > { %1267 = vmatmul.mubr.bf16.vlgmr.msra.gmra.mrb[12].mxu1 %v941_v49  ;;  %v1429_v49 = vld [vmem:[%s2650_s20 + $0x18] sm:$0xff] }
 0x2d3   : > { %v1205_v38 = vpop.f32.mrb[4].mxu1  ;;  %v1258_v40 = vpop.f32.mrb[4].mxu0 }
 0x2d4   : > { %v2628_v45 = vadd.f32 %v1205_v38, %v973_v33  ;;  %v1207_v48 = vpop.f32.mrb[5].mxu1  ;;  %v1260_v50 = vpop.f32.mrb[5].mxu0  ;;  %v2634_v58 = vadd.f32 %v1258_v40, %v975_v46  ;;  %v2742_v40 = vld [vmem:[%s2687_s30] sm:$0xff] }
 0x2d5   : > { %v2630_v55 = vadd.f32 %v1207_v48, %v974_v34  ;;  %v1209_v51 = vpop.f32.mrb[6].mxu1  ;;  %v1262_v52 = vpop.f32.mrb[6].mxu0  ;;  %v2640_v61 = vadd.f32 %v1260_v50, %v976_v53  ;;  %v2745_v48 = vld [vmem:[%s2687_s30 + $0x8] sm:$0xff] }
 0x2d6   : > { %v2632_v54 = vadd.f32 %v1209_v51, %v973_v33  ;;  %v1211_v56 = vpop.f32.mrb[7].mxu1  ;;  %v1264_v57 = vpop.f32.mrb[7].mxu0  ;;  %v2642_v62 = vadd.f32 %v1262_v52, %v975_v46 }
 0x2d7   : > { %v1281_v59 = vmax.f32 %v2628_v45, %v2630_v55  ;;  %v2638_v60 = vadd.f32 %v1211_v56, %v974_v34  ;;  %v2652_v3 = vadd.f32 %v1264_v57, %v976_v53  ;;  %v2766_v57 = vld [vmem:[%s2687_s30 + $0x10] sm:$0xff] }
 0x2d9   : > { %v1286_v63 = vmax.f32 %v2632_v54, %v2638_v60  ;;  %v1282_v2 = vmax.f32 %v1281_v59, %v2634_v58 }
 0x2db   : > { %v1215_v5 = vpop.f32.mrb[8].mxu1  ;;  %v1283_v6 = vmax.f32 %v1282_v2, %v2640_v61  ;;  %v1287_v8 = vmax.f32 %v1286_v63, %v2642_v62  ;;  %v2769_v63 = vld [vmem:[%s2687_s30 + $0x18] sm:$0xff] }
 0x2dc   : > { %v2656_v10 = vadd.f32 %v1215_v5, %v973_v33  ;;  %v1217_v12 = vpop.f32.mrb[9].mxu1 }
 0x2dd   : > { %v2661_v16 = vadd.f32 %v1217_v12, %v974_v34  ;;  %v1219_v18 = vpop.f32.mrb[10].mxu1  ;;  %1284 = vmax.xlane.f32.xlu1 %v1283_v6  ;;  %v1288_v19 = vmax.f32 %v1287_v8, %v2652_v3 }
 0x2de   : > { %v1452_v21 = vmul.f32 %v2659_v14, %v2656_v10  ;;  %v2669_v22 = vadd.f32 %v1219_v18, %v973_v33  ;;  %v1221_v23 = vpop.f32.mrb[11].mxu1  ;;  %v1434_v18 = vmul.f32 %v2659_v14, %v2628_v45 }
 0x2df   : > { %v1453_v24 = vmul.f32 %v2665_v20, %v2661_v16  ;;  %v2674_v25 = vadd.f32 %v1221_v23, %v974_v34  ;;  %1289 = vmax.xlane.f32.xlu0 %v1288_v19  ;;  %v1291_v32 = vmax.f32 %v2656_v10, %v2661_v16  ;;  %v2193_v34 = vmov 0.0  }
 0x2e0   : > { %v1461_v26 = vmul.f32 %v2659_v14, %v2669_v22  ;;  %949 = vst.msk [vmem:[%s2725_s12] sm:$0xff] %vm944_vm5, %v2193_v34  ;;  %950 = vst.msk [vmem:[%s2725_s12 + $0x8] sm:$0xff] %vm944_vm5, %v2193_v34  ;;  %v1435_v19 = vmul.f32 %v2665_v20, %v2630_v55  ;;  %v1444_v23 = vmul.f32 %v2665_v20, %v2638_v60 }
 0x2e1   : > { %v1462_v1 = vmul.f32 %v2665_v20, %v2674_v25  ;;  %v1456_v27 = vadd.f32 %v1453_v24, %v1452_v21  ;;  %v1296_v42 = vmax.f32 %v2669_v22, %v2674_v25  ;;  %951 = vst.msk [vmem:[%s2725_s12 + $0x10] sm:$0xff] %vm944_vm5, %v2193_v34  ;;  %952 = vst.msk [vmem:[%s2725_s12 + $0x18] sm:$0xff] %vm944_vm5, %v2193_v34 }
 0x2e2   : > { %v1443_v21 = vmul.f32 %v2659_v14, %v2632_v54  ;;  %v1438_v24 = vadd.f32 %v1435_v19, %v1434_v18  ;;  %953 = vst.msk [vmem:[%s2801_s19] sm:$0xff] %vm944_vm5, %v2193_v34  ;;  %954 = vst.msk [vmem:[%s2801_s19 + $0x8] sm:$0xff] %vm944_vm5, %v2193_v34  ;;  %v1436_v14 = vmul.f32 %v2702_v37, %v2634_v58 }
 0x2e3   : > { %v1465_v28 = vadd.f32 %v1462_v1, %v1461_v26  ;;  %955 = vst.msk [vmem:[%s2801_s19 + $0x10] sm:$0xff] %vm944_vm5, %v2193_v34  ;;  %956 = vst.msk [vmem:[%s2801_s19 + $0x18] sm:$0xff] %vm944_vm5, %v2193_v34  ;;  %v1445_v1 = vmul.f32 %v2702_v37, %v2642_v62 }
 0x2e4   : > { %v1439_v20 = vadd.f32 %v1438_v24, %v1436_v14  ;;  %v1447_v26 = vadd.f32 %v1444_v23, %v1443_v21 }
 0x2f3   : > { %v1268_v31 = vpop.f32.mrb[12].mxu1 }
 0x2f4   : > { %v2699_v35 = vadd.f32 %v1268_v31, %v975_v46  ;;  %v1270_v36 = vpop.f32.mrb[13].mxu1  ;;  %v1448_v31 = vadd.f32 %v1447_v26, %v1445_v1 }
 0x2f5   : > { %v2704_v39 = vadd.f32 %v1270_v36, %v976_v53  ;;  %v1272_v41 = vpop.f32.mrb[14].mxu1 }
 0x2f6   : > { %v1454_v43 = vmul.f32 %v2702_v37, %v2699_v35  ;;  %v2710_v44 = vadd.f32 %v1272_v41, %v975_v46  ;;  %v1274_v0 = vpop.f32.mrb[15].mxu1  ;;  %v1292_v47 = vmax.f32 %v1291_v32, %v2699_v35  ;;  %v1446_v32 = vmul.f32 %v1429_v49, %v2652_v3 }
 0x2f7   : > { %v2714_v4 = vadd.f32 %v1274_v0, %v976_v53  ;;  %v1455_v7 = vmul.f32 %v1429_v49, %v2704_v39 }
 0x2f8   : > { %v1463_v9 = vmul.f32 %v2702_v37, %v2710_v44  ;;  %v1293_v11 = vmax.f32 %v1292_v47, %v2704_v39  ;;  %v1297_v13 = vmax.f32 %v1296_v42, %v2710_v44  ;;  %v1457_v15 = vadd.f32 %v1456_v27, %v1454_v43 }
 0x2f9   : > { %v1464_v17 = vmul.f32 %v1429_v49, %v2714_v4  ;;  %v1437_v27 = vmul.f32 %v1429_v49, %v2640_v61  ;;  %v1449_v36 = vadd.f32 %v1448_v31, %v1446_v32 }
 0x2fa   : > { %1294 = vmax.xlane.f32.xlu0 %v1293_v11  ;;  %v1298_v29 = vmax.f32 %v1297_v13, %v2714_v4  ;;  %v2729_v30 = vadd.f32 %v1457_v15, %v1455_v7  ;;  %v1466_v33 = vadd.f32 %v1465_v28, %v1463_v9 }
 0x2fb   : > { %v1440_v28 = vadd.f32 %v1439_v20, %v1437_v27 }
 0x2fc   : > { %1299 = vmax.xlane.f32.xlu1 %v1298_v29  ;;  %v2739_v38 = vadd.f32 %v1466_v33, %v1464_v17 }
 0x36a   : > { %v1285_v46 = vpop.xlane.xlu1 %1284 }
 0x36b   : > { %v2748_v50 = vmax.f32 %v2742_v40, %v1285_v46 }
 0x36c   : > { %v1290_v51 = vpop.xlane.xlu0 %1289 }
 0x36d   : > { %v1305_v52 = vsub.f32 %v2742_v40, %v2748_v50  ;;  %1422 = vst.msk [vmem:[%s2687_s30] sm:$0xff] %vm944_vm5, %v2748_v50  ;;  %v2756_v53 = vmax.f32 %v2745_v48, %v1290_v51  ;;  %1327 = vperm.xlu0 %2004, %v2748_v50  }
 0x36f   : > { %v1306_v56 = vsub.f32 %v2745_v48, %v2756_v53  ;;  %1423 = vst.msk [vmem:[%s2687_s30 + $0x8] sm:$0xff] %vm944_vm5, %v2756_v53  ;;  %1332 = vperm.xlu1 %2005, %v2756_v53  }
 0x387   : > { %v1295_v59 = vpop.xlane.xlu0 %1294 }
 0x388   : > { %v2772_v2 = vmax.f32 %v2766_v57, %v1295_v59 }
 0x389   : > { %v1300_v5 = vpop.xlane.xlu1 %1299 }
 0x38a   : > { %v1307_v6 = vsub.f32 %v2766_v57, %v2772_v2  ;;  %1424 = vst.msk [vmem:[%s2687_s30 + $0x10] sm:$0xff] %vm944_vm5, %v2772_v2  ;;  %v2780_v8 = vmax.f32 %v2769_v63, %v1300_v5  ;;  %1337 = vperm.xlu1 %2005, %v2772_v2  }
 0x38c   : > { %v1308_v12 = vsub.f32 %v2769_v63, %v2780_v8  ;;  %1425 = vst.msk [vmem:[%s2687_s30 + $0x18] sm:$0xff] %vm944_vm5, %v2780_v8 }
 0x38e   : > { %1342 = vperm.xlu1 %2005, %v2780_v8  }
 0x3b2   : > { %1441 = vadd.xlane.f32.xlu1 %v1440_v28 }
 0x3b6   : > { %1450 = vadd.xlane.f32.xlu1 %v1449_v36 }
 0x3ec   : > { %v1328_v41 = vpop.permute.xlu0 %1327 }
 0x3ed   : > { %v1345_v42 = vsub.f32 %v2628_v45, %v1328_v41  ;;  %v1346_v43 = vsub.f32 %v2630_v55, %v1328_v41  ;;  %v1347_v0 = vsub.f32 %v2634_v58, %v1328_v41  ;;  %v1348_v47 = vsub.f32 %v2640_v61, %v1328_v41 }
 0x3ee   : > { %v1333_v7 = vpop.permute.xlu1 %1332 }
 0x3ef   : > { %v1361_v37 = vmul.f32 1.442695, %v1345_v42  ;;  %v1363_v9 = vmul.f32 1.442695, %v1346_v43  ;;  %v1365_v11 = vmul.f32 1.442695, %v1347_v0  ;;  %v1349_v13 = vsub.f32 %v2632_v54, %v1333_v7 }
 0x3f0   : > { %v1367_v15 = vmul.f32 1.442695, %v1348_v47  ;;  %v1350_v49 = vsub.f32 %v2638_v60, %v1333_v7  ;;  %v1351_v17 = vsub.f32 %v2642_v62, %v1333_v7  ;;  %v1352_v45 = vsub.f32 %v2652_v3, %v1333_v7 }
 0x3f1   : > { %2054 = vpow2.f32 %v1361_v37  ;;  %v1369_v29 = vmul.f32 1.442695, %v1349_v13 }
 0x3f2   : > { %2056 = vpow2.f32 %v1363_v9  ;;  %v1371_v55 = vmul.f32 1.442695, %v1350_v49  ;;  %v1373_v58 = vmul.f32 1.442695, %v1351_v17  ;;  %v1375_v61 = vmul.f32 1.442695, %v1352_v45 }
 0x3f3   : > { %2058 = vpow2.f32 %v1365_v11 }
 0x3f4   : > { %2060 = vpow2.f32 %v1367_v15 }
 0x3f5   : > { %2062 = vpow2.f32 %v1369_v29  ;;  %v1430_v29 = vld [vmem:[%s2801_s19] sm:$0xff] }
 0x3f6   : > { %2064 = vpow2.f32 %v1371_v55 }
 0x3f7   : > { %2066 = vpow2.f32 %v1373_v58  ;;  %v1431_v58 = vld [vmem:[%s2801_s19 + $0x8] sm:$0xff] }
 0x3f8   : > { %2068 = vpow2.f32 %v1375_v61 }
 0x3fb   : > { %v2055_v54 = vpop.eup %2054 }
 0x3fc   : > { %v2057_v33 = vpop.eup %2056 }
 0x3fd   : > { %v2059_v34 = vpop.eup %2058  ;;  %v1393_v60 = vadd.f32 %v2057_v33, %v2055_v54  ;;  %v1309_v33 = vmul.f32 1.442695, %v1305_v52 }
 0x3fe   : > { %v2061_v46 = vpop.eup %2060 }
 0x3ff   : > { %v2063_v62 = vpop.eup %2062  ;;  %v1394_v51 = vadd.f32 %v2059_v34, %v1393_v60  ;;  %v1317_v60 = vld [vmem:[%s2725_s12] sm:$0xff] }
 0x400   : > { %v2065_v59 = vpop.eup %2064 }
 0x401   : > { %v1395_v5 = vadd.f32 %v2061_v46, %v1394_v51  ;;  %v1398_v18 = vadd.f32 %v2065_v59, %v2063_v62  ;;  %v2067_v3 = vpop.eup %2066  ;;  %v1318_v59 = vld [vmem:[%s2725_s12 + $0x8] sm:$0xff] }
 0x402   : > { %v2069_v21 = vpop.eup %2068 }
 0x403   : > { %1396 = vadd.xlane.f32.xlu1 %v1395_v5  ;;  %v1399_v19 = vadd.f32 %v2067_v3, %v1398_v18  ;;  %v1432_v18 = vld [vmem:[%s2801_s19 + $0x10] sm:$0xff]  ;;  %v1315_v3 = vmul.f32 1.442695, %v1308_v12 }
 0x405   : > { %v1400_v23 = vadd.f32 %v2069_v21, %v1399_v19  ;;  %v1319_v21 = vld [vmem:[%s2725_s12 + $0x10] sm:$0xff] }
 0x407   : > { %1401 = vadd.xlane.f32.xlu0 %v1400_v23 }
 0x409   : > { %v1338_v24 = vpop.permute.xlu1 %1337 }
 0x40a   : > { %v1353_v14 = vsub.f32 %v2656_v10, %v1338_v24  ;;  %v1354_v20 = vsub.f32 %v2661_v16, %v1338_v24  ;;  %v1355_v26 = vsub.f32 %v2699_v35, %v1338_v24  ;;  %v1356_v1 = vsub.f32 %v2704_v39, %v1338_v24 }
 0x40b   : > { %1459 = vadd.xlane.f32.xlu0 %v2729_v30 }
 0x40c   : > { %v1377_v27 = vmul.f32 1.442695, %v1353_v14  ;;  %v1379_v28 = vmul.f32 1.442695, %v1354_v20  ;;  %v1381_v31 = vmul.f32 1.442695, %v1355_v26 }
 0x40d   : > { %v1383_v32 = vmul.f32 1.442695, %v1356_v1  ;;  %v1343_v36 = vpop.permute.xlu1 %1342  ;;  %v1320_v20 = vld [vmem:[%s2725_s12 + $0x18] sm:$0xff] }
 0x40e   : > { %2070 = vpow2.f32 %v1377_v27  ;;  %v1357_v41 = vsub.f32 %v2669_v22, %v1343_v36  ;;  %v1358_v42 = vsub.f32 %v2674_v25, %v1343_v36  ;;  %v1359_v10 = vsub.f32 %v2710_v44, %v1343_v36  ;;  %v1433_v1 = vld [vmem:[%s2801_s19 + $0x18] sm:$0xff] }
 0x40f   : > { %2072 = vpow2.f32 %v1379_v28  ;;  %v1360_v16 = vsub.f32 %v2714_v4, %v1343_v36 }
 0x410   : > { %2074 = vpow2.f32 %v1381_v31  ;;  %v1385_v35 = vmul.f32 1.442695, %v1357_v41  ;;  %v1387_v39 = vmul.f32 1.442695, %v1358_v42  ;;  %v1389_v30 = vmul.f32 1.442695, %v1359_v10 }
 0x411   : > { %2076 = vpow2.f32 %v1383_v32  ;;  %v1391_v43 = vmul.f32 1.442695, %v1360_v16 }
 0x412   : > { %2078 = vpow2.f32 %v1385_v35 }
 0x413   : > { %2080 = vpow2.f32 %v1387_v39 }
 0x414   : > { %2082 = vpow2.f32 %v1389_v30 }
 0x415   : > { %2084 = vpow2.f32 %v1391_v43 }
 0x416   : > { %2086 = vpow2.f32 %v1309_v33 }
 0x418   : > { %v2071_v0 = vpop.eup %2070 }
 0x419   : > { %v2073_v47 = vpop.eup %2072 }
 0x41a   : > { %v2075_v22 = vpop.eup %2074  ;;  %v1403_v25 = vadd.f32 %v2073_v47, %v2071_v0 }
 0x41b   : > { %v2077_v7 = vpop.eup %2076 }
 0x41c   : > { %v2079_v44 = vpop.eup %2078  ;;  %v1404_v4 = vadd.f32 %v2075_v22, %v1403_v25 }
 0x41d   : > { %v2081_v37 = vpop.eup %2080 }
 0x41e   : > { %v1405_v9 = vadd.f32 %v2077_v7, %v1404_v4  ;;  %v1408_v11 = vadd.f32 %v2081_v37, %v2079_v44  ;;  %v2083_v13 = vpop.eup %2082 }
 0x41f   : > { %v2085_v49 = vpop.eup %2084 }
 0x420   : > { %1406 = vadd.xlane.f32.xlu1 %v1405_v9  ;;  %v1409_v15 = vadd.f32 %v2083_v13, %v1408_v11  ;;  %v2087_v34 = vpop.eup %2086 }
 0x421   : > { %v1321_v46 = vmul.f32 %v2087_v34, %v1317_v60 }
 0x422   : > { %v1410_v17 = vadd.f32 %v2085_v49, %v1409_v15 }
 0x424   : > { %1411 = vadd.xlane.f32.xlu1 %v1410_v17 }
 0x428   : > { %1468 = vadd.xlane.f32.xlu1 %v2739_v38  ;;  %v1311_v38 = vmul.f32 1.442695, %v1306_v56  ;;  %v1313_v56 = vmul.f32 1.442695, %v1307_v6 }
 0x42a   : > { %2088 = vpow2.f32 %v1311_v38 }
 0x42b   : > { %2090 = vpow2.f32 %v1313_v56 }
 0x42c   : > { %2092 = vpow2.f32 %v1315_v3 }
 0x434   : > { %v2089_v62 = vpop.eup %2088 }
 0x435   : > { %v1322_v40 = vmul.f32 %v2089_v62, %v1318_v59  ;;  %v2091_v19 = vpop.eup %2090 }
 0x436   : > { %v1323_v23 = vmul.f32 %v2091_v19, %v1319_v21  ;;  %v2093_v24 = vpop.eup %2092 }
 0x437   : > { %v1324_v57 = vmul.f32 %v2093_v24, %v1320_v20 }
 0x43f   : > { %v1442_v45 = vpop.xlane.xlu1 %1441 }
 0x440   : > { %v1470_v55 = vadd.f32 %v1442_v45, %v1430_v29 }
 0x442   : > { %1474 = vst.msk [vmem:[%s2801_s19] sm:$0xff] %vm944_vm5, %v1470_v55 }
 0x443   : > { %v1451_v61 = vpop.xlane.xlu1 %1450 }
 0x444   : > { %v1471_v54 = vadd.f32 %v1451_v61, %v1431_v58 }
 0x446   : > { %1475 = vst.msk [vmem:[%s2801_s19 + $0x8] sm:$0xff] %vm944_vm5, %v1471_v54 }
 0x490   : > { %v1397_v51 = vpop.xlane.xlu1 %1396 }
 0x491   : > { %v1413_v5 = vadd.f32 %v1397_v51, %v1321_v46 }
 0x493   : > { %1418 = vst.msk [vmem:[%s2725_s12] sm:$0xff] %vm944_vm5, %v1413_v5 }
 0x494   : > { %v1402_v50 = vpop.xlane.xlu0 %1401 }
 0x495   : > { %v1414_v52 = vadd.f32 %v1402_v50, %v1322_v40 }
 0x497   : > { %1419 = vst.msk [vmem:[%s2725_s12 + $0x8] sm:$0xff] %vm944_vm5, %v1414_v52 }
 0x498   : > { %v1460_v48 = vpop.xlane.xlu0 %1459 }
 0x499   : > { %v1472_v53 = vadd.f32 %v1460_v48, %v1432_v18 }
 0x49b   : > { %1476 = vst.msk [vmem:[%s2801_s19 + $0x10] sm:$0xff] %vm944_vm5, %v1472_v53 }
 0x4ad   : > { %v1407_v14 = vpop.xlane.xlu1 %1406 }
 0x4ae   : > { %v1415_v26 = vadd.f32 %v1407_v14, %v1323_v23 }
 0x4b0   : > { %1420 = vst.msk [vmem:[%s2725_s12 + $0x10] sm:$0xff] %vm944_vm5, %v1415_v26 }
 0x4b1   : > { %v1412_v2 = vpop.xlane.xlu1 %1411 }
 0x4b2   : > { %v1416_v6 = vadd.f32 %v1412_v2, %v1324_v57 }
 0x4b4   : > { %1421 = vst.msk [vmem:[%s2725_s12 + $0x18] sm:$0xff] %vm944_vm5, %v1416_v6 }
 0x4b5   : > { %v1469_v27 = vpop.xlane.xlu1 %1468 }
 0x4b6   : > { %v1473_v63 = vadd.f32 %v1469_v27, %v1433_v1 }
 0x4b8   : > { %1477 = vst.msk [vmem:[%s2801_s19 + $0x18] sm:$0xff] %vm944_vm5, %v1473_v63 }
 0x4b9 PF: > { %s23_s17 = sadd.s32 1, %s2183_s17   ;;  %s2908_s29 = sld [smem:[#allocation10_spill]] }
 0x4ba   : > { %p20_p10 = scmp.ge.s32.totalorder %s23_s17, 4   ;;  %s2909_s13 = smov %s2171_s14 }
 0x4bb   : > { %s2910_s14 = smov %s2299_s25  ;;  %s2911_s15 = smov %s2179_s16 }
 0x4bc   :  { %22 = sbr.rel (!%p20_p10) target bundleno = 6 (0x6), region = 151 }
 0x4bf   : > { %s2912_s16 = smov %s2908_s29 }
 0x4c3   :  { %1531 = vsyncpa [#allocation4], 1 }
 0x4c4   :  { %1533 = vsyncpa [#allocation4 + $0x1], 1 }
 0x4c5   :  { %1534 = vsyncpa [#allocation5], 1 }
 0x4c6   :  { %1536 = vsyncpa [#allocation5 + $0x1], 1 }

</bundles_post_ra>
